<compile_context>
chip_gen: v6e
topology: v6e:2x2x1
jax: 0.10.0
libtpu: 0.0.40
codegen_flags: <defaults>
</compile_context>

<pallas_src>
import jax
import jax.numpy as jnp
from jax.experimental import pallas as pl
from jax.experimental.pallas import tpu as pltpu


def _lstm_forward_kernel(x_ref, w_emb_ref, b_emb_ref,
                         w_ih0_ref, w_hh0_ref, w_cat_ref, b_ref,
                         w_head_ref, b_head_ref, out_ref):
    T, Bb, D = x_ref.shape
    H = w_emb_ref.shape[1]
    G = 4 * H
    L = b_ref.shape[0]
    f32 = jnp.float32

    # ---- embedding + layer-0 input-hidden gates for ALL timesteps (one MXU pass each) ----
    x = x_ref[...].reshape(T * Bb, D)                                   # time-major rows
    emb = jnp.dot(x, w_emb_ref[...], preferred_element_type=f32) + b_emb_ref[...]
    x0_gates = jnp.dot(emb, w_ih0_ref[...], preferred_element_type=f32)  # [T*Bb, 4H]

    # ---- hoisted loop-invariants (emitted once, reused by every unrolled step) ----
    w_hh0 = w_hh0_ref[...]                                              # [H, 4H]
    w_cat = [w_cat_ref[l] for l in range(L - 1)]                        # [2H, 4H] each
    b_bc = [jnp.broadcast_to(b_ref[l], (Bb, G)) for l in range(L)]      # [Bb, 4H] each

    def apply_gates(gates, c_prev):
        # sigmoid/tanh once over the full 4H-lane vreg (EUP slot), slice afterwards.
        sg = 0.5 * (jnp.tanh(0.5 * gates) + 1.0)      # numerically-stable sigmoid, no vdiv
        tg = jnp.tanh(gates)
        i_g = sg[:, 0:H]
        f_g = sg[:, H:2 * H]
        g_g = tg[:, 2 * H:3 * H]
        o_g = sg[:, 3 * H:4 * H]
        c_new = f_g * c_prev + i_g * g_g
        h_new = o_g * jnp.tanh(c_new)
        return h_new, c_new

    zeros = jnp.zeros((Bb, H), f32)
    h = [zeros] * L                                   # per-layer carries (no stacking)
    c = [zeros] * L

    for t in range(T):                                # static unroll: T is small & static
        # layer 0: precomputed ih contribution + recurrent hh matmul
        g0 = (x0_gates[t * Bb:(t + 1) * Bb, :]
              + jnp.dot(h[0], w_hh0, preferred_element_type=f32)
              + b_bc[0])
        h[0], c[0] = apply_gates(g0, c[0])
        inp = h[0]
        for l in range(1, L):                         # fused [inp, h_l] @ [w_ih_l; w_hh_l]
            xh = jnp.concatenate([inp, h[l]], axis=-1)              # [Bb, 2H]
            gl = jnp.dot(xh, w_cat[l - 1], preferred_element_type=f32) + b_bc[l]
            h[l], c[l] = apply_gates(gl, c[l])
            inp = h[l]

    out = jnp.dot(h[L - 1], w_head_ref[...], preferred_element_type=f32) + b_head_ref[...]
    out_ref[...] = out.astype(out_ref.dtype)


def lstm_trajectory_predictor(traj, params, pred_len, *, block_b=None):
    """traj: [B, T, 2] -> [B, pred_len, 2].  Semantics match the PyTorch module."""
    B, T, D = traj.shape
    H = params['w_emb'].shape[1]
    L = params['w_ih'].shape[0]
    G = 4 * H
    O = 2 * pred_len
    assert L >= 2, "layers 1..L-1 are packed as fused weights; need num_layers >= 2"

    if block_b is None:
        block_b = B                                   # toy shapes: one block = whole batch
    assert B % block_b == 0
    grid = (B // block_b,)

    # Wrapper-side layout plumbing (free XLA reshapes/transposes):
    #   time-major f32 input so per-timestep slices in the kernel are contiguous.
    x_tb = jnp.transpose(traj, (1, 0, 2)).astype(jnp.float32)           # [T, B, D]
    # Layer 0 stays split (its ih part is precomputed over all T in-kernel);
    # layers 1..L-1 get fused [w_ih; w_hh] -> one matmul per layer-step.
    w_ih0 = params['w_ih'][0]                                           # [H, 4H]
    w_hh0 = params['w_hh'][0]                                           # [H, 4H]
    w_cat = jnp.concatenate([params['w_ih'][1:], params['w_hh'][1:]], axis=1)  # [L-1,2H,4H]

    # NOTE: for v6e/v7x, weights could be cast to bf16 here (keep f32 accumulation);
    # kept f32 for the strict 1e-4 check against the f32 reference.
    out2d = pl.pallas_call(
        _lstm_forward_kernel,
        out_shape=jax.ShapeDtypeStruct((B, O), jnp.float32),
        grid_spec=pltpu.PrefetchScalarGridSpec(
            num_scalar_prefetch=0,
            grid=grid,
            in_specs=[
                pl.BlockSpec((T, block_b, D), lambda i: (0, i, 0)),     # traj (time-major)
                pl.BlockSpec((D, H), lambda i: (0, 0)),                 # w_emb
                pl.BlockSpec((1, H), lambda i: (0, 0)),                 # b_emb
                pl.BlockSpec((H, G), lambda i: (0, 0)),                 # w_ih layer 0
                pl.BlockSpec((H, G), lambda i: (0, 0)),                 # w_hh layer 0
                pl.BlockSpec((L - 1, 2 * H, G), lambda i: (0, 0, 0)),   # fused layers 1..
                pl.BlockSpec((L, 1, G), lambda i: (0, 0, 0)),           # biases (b_ih+b_hh)
                pl.BlockSpec((H, O), lambda i: (0, 0)),                 # w_head
                pl.BlockSpec((1, O), lambda i: (0, 0)),                 # b_head
            ],
            out_specs=pl.BlockSpec((block_b, O), lambda i: (i, 0)),
        ),
        compiler_params=pltpu.CompilerParams(
            dimension_semantics=("parallel",)),
    )(x_tb, params['w_emb'], params['b_emb'],
      w_ih0, w_hh0, w_cat, params['b'],
      params['w_head'], params['b_head'])
    return out2d.reshape(B, pred_len, 2)


def init_params(key, input_dim=2, hidden_dim=32, num_layers=3, pred_len=6):
    H = hidden_dim
    ks = jax.random.split(key, 7)
    bound = 1.0 / float(jnp.sqrt(float(H)))
    u = lambda k, shape: jax.random.uniform(k, shape, jnp.float32, -bound, bound)
    return {
        'w_emb': u(ks[0], (input_dim, H)),
        'b_emb': u(ks[1], (1, H)),
        'w_ih': u(ks[2], (num_layers, H, 4 * H)),
        'w_hh': u(ks[3], (num_layers, H, 4 * H)),
        'b': u(ks[4], (num_layers, 1, 4 * H)),        # b_ih + b_hh combined
        'w_head': u(ks[5], (H, 2 * pred_len)),
        'b_head': u(ks[6], (1, 2 * pred_len)),
    }


def reference_forward(traj, params, pred_len):
    """Pure-JAX reference with identical semantics (PyTorch nn.LSTM, batch_first)."""
    B, T, D = traj.shape
    H = params['w_emb'].shape[1]
    L = params['w_ih'].shape[0]
    x = traj @ params['w_emb'] + params['b_emb'][0]
    h = jnp.zeros((L, B, H), jnp.float32)
    c = jnp.zeros((L, B, H), jnp.float32)
    for t in range(T):
        inp = x[:, t, :]
        hs, cs = [], []
        for l in range(L):
            gates = inp @ params['w_ih'][l] + h[l] @ params['w_hh'][l] + params['b'][l]
            i = jax.nn.sigmoid(gates[:, 0:H])
            f = jax.nn.sigmoid(gates[:, H:2 * H])
            g = jnp.tanh(gates[:, 2 * H:3 * H])
            o = jax.nn.sigmoid(gates[:, 3 * H:4 * H])
            c_l = f * c[l] + i * g
            h_l = o * jnp.tanh(c_l)
            hs.append(h_l)
            cs.append(c_l)
            inp = h_l
        h, c = jnp.stack(hs), jnp.stack(cs)
    out = h[-1] @ params['w_head'] + params['b_head'][0]
    return out.reshape(B, pred_len, 2)


if __name__ == "__main__":
    B, T, D = 2, 8, 2           # batch, seq_len, input_dim
    H, L, PRED = 32, 3, 6       # hidden_dim, num_layers, pred_len

    key = jax.random.PRNGKey(0)
    k_x, k_p = jax.random.split(key)
    traj = jax.random.normal(k_x, (B, T, D), jnp.float32)
    params = init_params(k_p, input_dim=D, hidden_dim=H, num_layers=L, pred_len=PRED)

    out = lstm_trajectory_predictor(traj, params, PRED)
    out = jax.block_until_ready(out)

    ref = reference_forward(traj, params, PRED)
    assert out.shape == (B, PRED, 2), out.shape
    assert jnp.allclose(out, ref, atol=1e-4, rtol=1e-4), (
        f"max abs diff {jnp.max(jnp.abs(out - ref))}")

    print("KERNEL_OK")
</pallas_src>

<mosaic_0001>
module attributes {stable_mosaic.version = 11 : i64} {
  func.func @_lstm_forward_kernel(%arg0: i32, %arg1: memref<8x2x2xf32, #tpu.memory_space<vmem>>, %arg2: memref<2x32xf32, #tpu.memory_space<vmem>>, %arg3: memref<1x32xf32, #tpu.memory_space<vmem>>, %arg4: memref<32x128xf32, #tpu.memory_space<vmem>>, %arg5: memref<32x128xf32, #tpu.memory_space<vmem>>, %arg6: memref<2x64x128xf32, #tpu.memory_space<vmem>>, %arg7: memref<3x1x128xf32, #tpu.memory_space<vmem>>, %arg8: memref<32x12xf32, #tpu.memory_space<vmem>>, %arg9: memref<1x12xf32, #tpu.memory_space<vmem>>, %arg10: memref<2x12xf32, #tpu.memory_space<vmem>>) attributes {dimension_semantics = [#tpu.dimension_semantics<parallel>], iteration_bounds = array<i64: 1>, scalar_prefetch = 0 : i64, scratch_operands = 0 : i64, tpu.core_type = #tpu.core_type<tc>, window_params = [{transform_indices = @transform_0, window_bounds = array<i64: 8, 2, 2>}, {pipeline_mode = #tpu.pipeline_mode<synchronous>, transform_indices = @transform_1, window_bounds = array<i64: 2, 32>}, {pipeline_mode = #tpu.pipeline_mode<synchronous>, transform_indices = @transform_2, window_bounds = array<i64: 1, 32>}, {pipeline_mode = #tpu.pipeline_mode<synchronous>, transform_indices = @transform_3, window_bounds = array<i64: 32, 128>}, {pipeline_mode = #tpu.pipeline_mode<synchronous>, transform_indices = @transform_4, window_bounds = array<i64: 32, 128>}, {pipeline_mode = #tpu.pipeline_mode<synchronous>, transform_indices = @transform_5, window_bounds = array<i64: 2, 64, 128>}, {pipeline_mode = #tpu.pipeline_mode<synchronous>, transform_indices = @transform_6, window_bounds = array<i64: 3, 1, 128>}, {pipeline_mode = #tpu.pipeline_mode<synchronous>, transform_indices = @transform_7, window_bounds = array<i64: 32, 12>}, {pipeline_mode = #tpu.pipeline_mode<synchronous>, transform_indices = @transform_8, window_bounds = array<i64: 1, 12>}, {transform_indices = @transform_9, window_bounds = array<i64: 2, 12>}]} {
    %c0 = arith.constant 0 : index
    %c0_0 = arith.constant 0 : index
    %c0_1 = arith.constant 0 : index
    %0 = vector.load %arg1[%c0, %c0_0, %c0_1] : memref<8x2x2xf32, #tpu.memory_space<vmem>>, vector<8x2x2xf32>
    %1 = vector.shape_cast %0 : vector<8x2x2xf32> to vector<16x2xf32>
    %c0_2 = arith.constant 0 : index
    %c0_3 = arith.constant 0 : index
    %2 = vector.load %arg2[%c0_2, %c0_3] : memref<2x32xf32, #tpu.memory_space<vmem>>, vector<2x32xf32>
    %cst = arith.constant dense<0.000000e+00> : vector<16x32xf32>
    %3 = tpu.matmul %1, %2, %cst {dimension_numbers = #tpu.dot_dimension_numbers<[1], [0], [0], [1], [0, 0, 1, 1], [], []>} : vector<16x2xf32>, vector<2x32xf32>, vector<16x32xf32> -> vector<16x32xf32>
    %c0_4 = arith.constant 0 : index
    %c0_5 = arith.constant 0 : index
    %4 = vector.load %arg3[%c0_4, %c0_5] : memref<1x32xf32, #tpu.memory_space<vmem>>, vector<1x32xf32>
    %5 = vector.broadcast %4 : vector<1x32xf32> to vector<16x32xf32>
    %6 = arith.addf %3, %5 : vector<16x32xf32>
    %c0_6 = arith.constant 0 : index
    %c0_7 = arith.constant 0 : index
    %7 = vector.load %arg4[%c0_6, %c0_7] : memref<32x128xf32, #tpu.memory_space<vmem>>, vector<32x128xf32>
    %cst_8 = arith.constant dense<0.000000e+00> : vector<16x128xf32>
    %8 = tpu.matmul %6, %7, %cst_8 {dimension_numbers = #tpu.dot_dimension_numbers<[1], [0], [0], [1], [0, 0, 1, 1], [], []>} : vector<16x32xf32>, vector<32x128xf32>, vector<16x128xf32> -> vector<16x128xf32>
    %c0_9 = arith.constant 0 : index
    %c0_10 = arith.constant 0 : index
    %9 = vector.load %arg5[%c0_9, %c0_10] : memref<32x128xf32, #tpu.memory_space<vmem>>, vector<32x128xf32>
    %c0_11 = arith.constant 0 : index
    %c0_12 = arith.constant 0 : index
    %c0_13 = arith.constant 0 : index
    %10 = vector.load %arg6[%c0_11, %c0_12, %c0_13] : memref<2x64x128xf32, #tpu.memory_space<vmem>>, vector<1x64x128xf32>
    %11 = vector.shape_cast %10 : vector<1x64x128xf32> to vector<64x128xf32>
    %c1 = arith.constant 1 : index
    %c0_14 = arith.constant 0 : index
    %c0_15 = arith.constant 0 : index
    %12 = vector.load %arg6[%c1, %c0_14, %c0_15] : memref<2x64x128xf32, #tpu.memory_space<vmem>>, vector<1x64x128xf32>
    %13 = vector.shape_cast %12 : vector<1x64x128xf32> to vector<64x128xf32>
    %c0_16 = arith.constant 0 : index
    %c0_17 = arith.constant 0 : index
    %c0_18 = arith.constant 0 : index
    %14 = vector.load %arg7[%c0_16, %c0_17, %c0_18] : memref<3x1x128xf32, #tpu.memory_space<vmem>>, vector<1x1x128xf32>
    %15 = vector.shape_cast %14 : vector<1x1x128xf32> to vector<1x128xf32>
    %16 = vector.shape_cast %15 : vector<1x128xf32> to vector<1x128xf32>
    %17 = vector.broadcast %16 : vector<1x128xf32> to vector<2x128xf32>
    %c1_19 = arith.constant 1 : index
    %c0_20 = arith.constant 0 : index
    %c0_21 = arith.constant 0 : index
    %18 = vector.load %arg7[%c1_19, %c0_20, %c0_21] : memref<3x1x128xf32, #tpu.memory_space<vmem>>, vector<1x1x128xf32>
    %19 = vector.shape_cast %18 : vector<1x1x128xf32> to vector<1x128xf32>
    %20 = vector.shape_cast %19 : vector<1x128xf32> to vector<1x128xf32>
    %21 = vector.broadcast %20 : vector<1x128xf32> to vector<2x128xf32>
    %c2 = arith.constant 2 : index
    %c0_22 = arith.constant 0 : index
    %c0_23 = arith.constant 0 : index
    %22 = vector.load %arg7[%c2, %c0_22, %c0_23] : memref<3x1x128xf32, #tpu.memory_space<vmem>>, vector<1x1x128xf32>
    %23 = vector.shape_cast %22 : vector<1x1x128xf32> to vector<1x128xf32>
    %24 = vector.shape_cast %23 : vector<1x128xf32> to vector<1x128xf32>
    %25 = vector.broadcast %24 : vector<1x128xf32> to vector<2x128xf32>
    %cst_24 = arith.constant 0.000000e+00 : f32
    %26 = vector.broadcast %cst_24 : f32 to vector<2x32xf32>
    %27 = vector.extract_strided_slice %8 {offsets = [0, 0], sizes = [2, 128], strides = [1, 1]} : vector<16x128xf32> to vector<2x128xf32>
    %cst_25 = arith.constant dense<0.000000e+00> : vector<2x128xf32>
    %28 = tpu.matmul %26, %9, %cst_25 {dimension_numbers = #tpu.dot_dimension_numbers<[1], [0], [0], [1], [0, 0, 1, 1], [], []>} : vector<2x32xf32>, vector<32x128xf32>, vector<2x128xf32> -> vector<2x128xf32>
    %29 = arith.addf %27, %28 : vector<2x128xf32>
    %30 = arith.addf %29, %17 : vector<2x128xf32>
    %cst_26 = arith.constant 5.000000e-01 : f32
    %31 = vector.broadcast %cst_26 : f32 to vector<2x128xf32>
    %32 = arith.mulf %31, %30 : vector<2x128xf32>
    %33 = math.tanh %32 : vector<2x128xf32>
    %cst_27 = arith.constant 1.000000e+00 : f32
    %34 = vector.broadcast %cst_27 : f32 to vector<2x128xf32>
    %35 = arith.addf %33, %34 : vector<2x128xf32>
    %cst_28 = arith.constant 5.000000e-01 : f32
    %36 = vector.broadcast %cst_28 : f32 to vector<2x128xf32>
    %37 = arith.mulf %36, %35 : vector<2x128xf32>
    %38 = math.tanh %30 : vector<2x128xf32>
    %39 = vector.extract_strided_slice %37 {offsets = [0, 0], sizes = [2, 32], strides = [1, 1]} : vector<2x128xf32> to vector<2x32xf32>
    %40 = vector.extract_strided_slice %37 {offsets = [0, 32], sizes = [2, 32], strides = [1, 1]} : vector<2x128xf32> to vector<2x32xf32>
    %41 = vector.extract_strided_slice %38 {offsets = [0, 64], sizes = [2, 32], strides = [1, 1]} : vector<2x128xf32> to vector<2x32xf32>
    %42 = vector.extract_strided_slice %37 {offsets = [0, 96], sizes = [2, 32], strides = [1, 1]} : vector<2x128xf32> to vector<2x32xf32>
    %43 = arith.mulf %40, %26 : vector<2x32xf32>
    %44 = arith.mulf %39, %41 : vector<2x32xf32>
    %45 = arith.addf %43, %44 : vector<2x32xf32>
    %46 = math.tanh %45 : vector<2x32xf32>
    %47 = arith.mulf %42, %46 : vector<2x32xf32>
    %48 = tpu.concatenate %47, %26 in 1 : vector<2x32xf32>, vector<2x32xf32> -> vector<2x64xf32>
    %cst_29 = arith.constant dense<0.000000e+00> : vector<2x128xf32>
    %49 = tpu.matmul %48, %11, %cst_29 {dimension_numbers = #tpu.dot_dimension_numbers<[1], [0], [0], [1], [0, 0, 1, 1], [], []>} : vector<2x64xf32>, vector<64x128xf32>, vector<2x128xf32> -> vector<2x128xf32>
    %50 = arith.addf %49, %21 : vector<2x128xf32>
    %cst_30 = arith.constant 5.000000e-01 : f32
    %51 = vector.broadcast %cst_30 : f32 to vector<2x128xf32>
    %52 = arith.mulf %51, %50 : vector<2x128xf32>
    %53 = math.tanh %52 : vector<2x128xf32>
    %cst_31 = arith.constant 1.000000e+00 : f32
    %54 = vector.broadcast %cst_31 : f32 to vector<2x128xf32>
    %55 = arith.addf %53, %54 : vector<2x128xf32>
    %cst_32 = arith.constant 5.000000e-01 : f32
    %56 = vector.broadcast %cst_32 : f32 to vector<2x128xf32>
    %57 = arith.mulf %56, %55 : vector<2x128xf32>
    %58 = math.tanh %50 : vector<2x128xf32>
    %59 = vector.extract_strided_slice %57 {offsets = [0, 0], sizes = [2, 32], strides = [1, 1]} : vector<2x128xf32> to vector<2x32xf32>
    %60 = vector.extract_strided_slice %57 {offsets = [0, 32], sizes = [2, 32], strides = [1, 1]} : vector<2x128xf32> to vector<2x32xf32>
    %61 = vector.extract_strided_slice %58 {offsets = [0, 64], sizes = [2, 32], strides = [1, 1]} : vector<2x128xf32> to vector<2x32xf32>
    %62 = vector.extract_strided_slice %57 {offsets = [0, 96], sizes = [2, 32], strides = [1, 1]} : vector<2x128xf32> to vector<2x32xf32>
    %63 = arith.mulf %60, %26 : vector<2x32xf32>
    %64 = arith.mulf %59, %61 : vector<2x32xf32>
    %65 = arith.addf %63, %64 : vector<2x32xf32>
    %66 = math.tanh %65 : vector<2x32xf32>
    %67 = arith.mulf %62, %66 : vector<2x32xf32>
    %68 = tpu.concatenate %67, %26 in 1 : vector<2x32xf32>, vector<2x32xf32> -> vector<2x64xf32>
    %cst_33 = arith.constant dense<0.000000e+00> : vector<2x128xf32>
    %69 = tpu.matmul %68, %13, %cst_33 {dimension_numbers = #tpu.dot_dimension_numbers<[1], [0], [0], [1], [0, 0, 1, 1], [], []>} : vector<2x64xf32>, vector<64x128xf32>, vector<2x128xf32> -> vector<2x128xf32>
    %70 = arith.addf %69, %25 : vector<2x128xf32>
    %cst_34 = arith.constant 5.000000e-01 : f32
    %71 = vector.broadcast %cst_34 : f32 to vector<2x128xf32>
    %72 = arith.mulf %71, %70 : vector<2x128xf32>
    %73 = math.tanh %72 : vector<2x128xf32>
    %cst_35 = arith.constant 1.000000e+00 : f32
    %74 = vector.broadcast %cst_35 : f32 to vector<2x128xf32>
    %75 = arith.addf %73, %74 : vector<2x128xf32>
    %cst_36 = arith.constant 5.000000e-01 : f32
    %76 = vector.broadcast %cst_36 : f32 to vector<2x128xf32>
    %77 = arith.mulf %76, %75 : vector<2x128xf32>
    %78 = math.tanh %70 : vector<2x128xf32>
    %79 = vector.extract_strided_slice %77 {offsets = [0, 0], sizes = [2, 32], strides = [1, 1]} : vector<2x128xf32> to vector<2x32xf32>
    %80 = vector.extract_strided_slice %77 {offsets = [0, 32], sizes = [2, 32], strides = [1, 1]} : vector<2x128xf32> to vector<2x32xf32>
    %81 = vector.extract_strided_slice %78 {offsets = [0, 64], sizes = [2, 32], strides = [1, 1]} : vector<2x128xf32> to vector<2x32xf32>
    %82 = vector.extract_strided_slice %77 {offsets = [0, 96], sizes = [2, 32], strides = [1, 1]} : vector<2x128xf32> to vector<2x32xf32>
    %83 = arith.mulf %80, %26 : vector<2x32xf32>
    %84 = arith.mulf %79, %81 : vector<2x32xf32>
    %85 = arith.addf %83, %84 : vector<2x32xf32>
    %86 = math.tanh %85 : vector<2x32xf32>
    %87 = arith.mulf %82, %86 : vector<2x32xf32>
    %88 = vector.extract_strided_slice %8 {offsets = [2, 0], sizes = [2, 128], strides = [1, 1]} : vector<16x128xf32> to vector<2x128xf32>
    %cst_37 = arith.constant dense<0.000000e+00> : vector<2x128xf32>
    %89 = tpu.matmul %47, %9, %cst_37 {dimension_numbers = #tpu.dot_dimension_numbers<[1], [0], [0], [1], [0, 0, 1, 1], [], []>} : vector<2x32xf32>, vector<32x128xf32>, vector<2x128xf32> -> vector<2x128xf32>
    %90 = arith.addf %88, %89 : vector<2x128xf32>
    %91 = arith.addf %90, %17 : vector<2x128xf32>
    %cst_38 = arith.constant 5.000000e-01 : f32
    %92 = vector.broadcast %cst_38 : f32 to vector<2x128xf32>
    %93 = arith.mulf %92, %91 : vector<2x128xf32>
    %94 = math.tanh %93 : vector<2x128xf32>
    %cst_39 = arith.constant 1.000000e+00 : f32
    %95 = vector.broadcast %cst_39 : f32 to vector<2x128xf32>
    %96 = arith.addf %94, %95 : vector<2x128xf32>
    %cst_40 = arith.constant 5.000000e-01 : f32
    %97 = vector.broadcast %cst_40 : f32 to vector<2x128xf32>
    %98 = arith.mulf %97, %96 : vector<2x128xf32>
    %99 = math.tanh %91 : vector<2x128xf32>
    %100 = vector.extract_strided_slice %98 {offsets = [0, 0], sizes = [2, 32], strides = [1, 1]} : vector<2x128xf32> to vector<2x32xf32>
    %101 = vector.extract_strided_slice %98 {offsets = [0, 32], sizes = [2, 32], strides = [1, 1]} : vector<2x128xf32> to vector<2x32xf32>
    %102 = vector.extract_strided_slice %99 {offsets = [0, 64], sizes = [2, 32], strides = [1, 1]} : vector<2x128xf32> to vector<2x32xf32>
    %103 = vector.extract_strided_slice %98 {offsets = [0, 96], sizes = [2, 32], strides = [1, 1]} : vector<2x128xf32> to vector<2x32xf32>
    %104 = arith.mulf %101, %45 : vector<2x32xf32>
    %105 = arith.mulf %100, %102 : vector<2x32xf32>
    %106 = arith.addf %104, %105 : vector<2x32xf32>
    %107 = math.tanh %106 : vector<2x32xf32>
    %108 = arith.mulf %103, %107 : vector<2x32xf32>
    %109 = tpu.concatenate %108, %67 in 1 : vector<2x32xf32>, vector<2x32xf32> -> vector<2x64xf32>
    %cst_41 = arith.constant dense<0.000000e+00> : vector<2x128xf32>
    %110 = tpu.matmul %109, %11, %cst_41 {dimension_numbers = #tpu.dot_dimension_numbers<[1], [0], [0], [1], [0, 0, 1, 1], [], []>} : vector<2x64xf32>, vector<64x128xf32>, vector<2x128xf32> -> vector<2x128xf32>
    %111 = arith.addf %110, %21 : vector<2x128xf32>
    %cst_42 = arith.constant 5.000000e-01 : f32
    %112 = vector.broadcast %cst_42 : f32 to vector<2x128xf32>
    %113 = arith.mulf %112, %111 : vector<2x128xf32>
    %114 = math.tanh %113 : vector<2x128xf32>
    %cst_43 = arith.constant 1.000000e+00 : f32
    %115 = vector.broadcast %cst_43 : f32 to vector<2x128xf32>
    %116 = arith.addf %114, %115 : vector<2x128xf32>
    %cst_44 = arith.constant 5.000000e-01 : f32
    %117 = vector.broadcast %cst_44 : f32 to vector<2x128xf32>
    %118 = arith.mulf %117, %116 : vector<2x128xf32>
    %119 = math.tanh %111 : vector<2x128xf32>
    %120 = vector.extract_strided_slice %118 {offsets = [0, 0], sizes = [2, 32], strides = [1, 1]} : vector<2x128xf32> to vector<2x32xf32>
    %121 = vector.extract_strided_slice %118 {offsets = [0, 32], sizes = [2, 32], strides = [1, 1]} : vector<2x128xf32> to vector<2x32xf32>
    %122 = vector.extract_strided_slice %119 {offsets = [0, 64], sizes = [2, 32], strides = [1, 1]} : vector<2x128xf32> to vector<2x32xf32>
    %123 = vector.extract_strided_slice %118 {offsets = [0, 96], sizes = [2, 32], strides = [1, 1]} : vector<2x128xf32> to vector<2x32xf32>
    %124 = arith.mulf %121, %65 : vector<2x32xf32>
    %125 = arith.mulf %120, %122 : vector<2x32xf32>
    %126 = arith.addf %124, %125 : vector<2x32xf32>
    %127 = math.tanh %126 : vector<2x32xf32>
    %128 = arith.mulf %123, %127 : vector<2x32xf32>
    %129 = tpu.concatenate %128, %87 in 1 : vector<2x32xf32>, vector<2x32xf32> -> vector<2x64xf32>
    %cst_45 = arith.constant dense<0.000000e+00> : vector<2x128xf32>
    %130 = tpu.matmul %129, %13, %cst_45 {dimension_numbers = #tpu.dot_dimension_numbers<[1], [0], [0], [1], [0, 0, 1, 1], [], []>} : vector<2x64xf32>, vector<64x128xf32>, vector<2x128xf32> -> vector<2x128xf32>
    %131 = arith.addf %130, %25 : vector<2x128xf32>
    %cst_46 = arith.constant 5.000000e-01 : f32
    %132 = vector.broadcast %cst_46 : f32 to vector<2x128xf32>
    %133 = arith.mulf %132, %131 : vector<2x128xf32>
    %134 = math.tanh %133 : vector<2x128xf32>
    %cst_47 = arith.constant 1.000000e+00 : f32
    %135 = vector.broadcast %cst_47 : f32 to vector<2x128xf32>
    %136 = arith.addf %134, %135 : vector<2x128xf32>
    %cst_48 = arith.constant 5.000000e-01 : f32
    %137 = vector.broadcast %cst_48 : f32 to vector<2x128xf32>
    %138 = arith.mulf %137, %136 : vector<2x128xf32>
    %139 = math.tanh %131 : vector<2x128xf32>
    %140 = vector.extract_strided_slice %138 {offsets = [0, 0], sizes = [2, 32], strides = [1, 1]} : vector<2x128xf32> to vector<2x32xf32>
    %141 = vector.extract_strided_slice %138 {offsets = [0, 32], sizes = [2, 32], strides = [1, 1]} : vector<2x128xf32> to vector<2x32xf32>
    %142 = vector.extract_strided_slice %139 {offsets = [0, 64], sizes = [2, 32], strides = [1, 1]} : vector<2x128xf32> to vector<2x32xf32>
    %143 = vector.extract_strided_slice %138 {offsets = [0, 96], sizes = [2, 32], strides = [1, 1]} : vector<2x128xf32> to vector<2x32xf32>
    %144 = arith.mulf %141, %85 : vector<2x32xf32>
    %145 = arith.mulf %140, %142 : vector<2x32xf32>
    %146 = arith.addf %144, %145 : vector<2x32xf32>
    %147 = math.tanh %146 : vector<2x32xf32>
    %148 = arith.mulf %143, %147 : vector<2x32xf32>
    %149 = vector.extract_strided_slice %8 {offsets = [4, 0], sizes = [2, 128], strides = [1, 1]} : vector<16x128xf32> to vector<2x128xf32>
    %cst_49 = arith.constant dense<0.000000e+00> : vector<2x128xf32>
    %150 = tpu.matmul %108, %9, %cst_49 {dimension_numbers = #tpu.dot_dimension_numbers<[1], [0], [0], [1], [0, 0, 1, 1], [], []>} : vector<2x32xf32>, vector<32x128xf32>, vector<2x128xf32> -> vector<2x128xf32>
    %151 = arith.addf %149, %150 : vector<2x128xf32>
    %152 = arith.addf %151, %17 : vector<2x128xf32>
    %cst_50 = arith.constant 5.000000e-01 : f32
    %153 = vector.broadcast %cst_50 : f32 to vector<2x128xf32>
    %154 = arith.mulf %153, %152 : vector<2x128xf32>
    %155 = math.tanh %154 : vector<2x128xf32>
    %cst_51 = arith.constant 1.000000e+00 : f32
    %156 = vector.broadcast %cst_51 : f32 to vector<2x128xf32>
    %157 = arith.addf %155, %156 : vector<2x128xf32>
    %cst_52 = arith.constant 5.000000e-01 : f32
    %158 = vector.broadcast %cst_52 : f32 to vector<2x128xf32>
    %159 = arith.mulf %158, %157 : vector<2x128xf32>
    %160 = math.tanh %152 : vector<2x128xf32>
    %161 = vector.extract_strided_slice %159 {offsets = [0, 0], sizes = [2, 32], strides = [1, 1]} : vector<2x128xf32> to vector<2x32xf32>
    %162 = vector.extract_strided_slice %159 {offsets = [0, 32], sizes = [2, 32], strides = [1, 1]} : vector<2x128xf32> to vector<2x32xf32>
    %163 = vector.extract_strided_slice %160 {offsets = [0, 64], sizes = [2, 32], strides = [1, 1]} : vector<2x128xf32> to vector<2x32xf32>
    %164 = vector.extract_strided_slice %159 {offsets = [0, 96], sizes = [2, 32], strides = [1, 1]} : vector<2x128xf32> to vector<2x32xf32>
    %165 = arith.mulf %162, %106 : vector<2x32xf32>
    %166 = arith.mulf %161, %163 : vector<2x32xf32>
    %167 = arith.addf %165, %166 : vector<2x32xf32>
    %168 = math.tanh %167 : vector<2x32xf32>
    %169 = arith.mulf %164, %168 : vector<2x32xf32>
    %170 = tpu.concatenate %169, %128 in 1 : vector<2x32xf32>, vector<2x32xf32> -> vector<2x64xf32>
    %cst_53 = arith.constant dense<0.000000e+00> : vector<2x128xf32>
    %171 = tpu.matmul %170, %11, %cst_53 {dimension_numbers = #tpu.dot_dimension_numbers<[1], [0], [0], [1], [0, 0, 1, 1], [], []>} : vector<2x64xf32>, vector<64x128xf32>, vector<2x128xf32> -> vector<2x128xf32>
    %172 = arith.addf %171, %21 : vector<2x128xf32>
    %cst_54 = arith.constant 5.000000e-01 : f32
    %173 = vector.broadcast %cst_54 : f32 to vector<2x128xf32>
    %174 = arith.mulf %173, %172 : vector<2x128xf32>
    %175 = math.tanh %174 : vector<2x128xf32>
    %cst_55 = arith.constant 1.000000e+00 : f32
    %176 = vector.broadcast %cst_55 : f32 to vector<2x128xf32>
    %177 = arith.addf %175, %176 : vector<2x128xf32>
    %cst_56 = arith.constant 5.000000e-01 : f32
    %178 = vector.broadcast %cst_56 : f32 to vector<2x128xf32>
    %179 = arith.mulf %178, %177 : vector<2x128xf32>
    %180 = math.tanh %172 : vector<2x128xf32>
    %181 = vector.extract_strided_slice %179 {offsets = [0, 0], sizes = [2, 32], strides = [1, 1]} : vector<2x128xf32> to vector<2x32xf32>
    %182 = vector.extract_strided_slice %179 {offsets = [0, 32], sizes = [2, 32], strides = [1, 1]} : vector<2x128xf32> to vector<2x32xf32>
    %183 = vector.extract_strided_slice %180 {offsets = [0, 64], sizes = [2, 32], strides = [1, 1]} : vector<2x128xf32> to vector<2x32xf32>
    %184 = vector.extract_strided_slice %179 {offsets = [0, 96], sizes = [2, 32], strides = [1, 1]} : vector<2x128xf32> to vector<2x32xf32>
    %185 = arith.mulf %182, %126 : vector<2x32xf32>
    %186 = arith.mulf %181, %183 : vector<2x32xf32>
    %187 = arith.addf %185, %186 : vector<2x32xf32>
    %188 = math.tanh %187 : vector<2x32xf32>
    %189 = arith.mulf %184, %188 : vector<2x32xf32>
    %190 = tpu.concatenate %189, %148 in 1 : vector<2x32xf32>, vector<2x32xf32> -> vector<2x64xf32>
    %cst_57 = arith.constant dense<0.000000e+00> : vector<2x128xf32>
    %191 = tpu.matmul %190, %13, %cst_57 {dimension_numbers = #tpu.dot_dimension_numbers<[1], [0], [0], [1], [0, 0, 1, 1], [], []>} : vector<2x64xf32>, vector<64x128xf32>, vector<2x128xf32> -> vector<2x128xf32>
    %192 = arith.addf %191, %25 : vector<2x128xf32>
    %cst_58 = arith.constant 5.000000e-01 : f32
    %193 = vector.broadcast %cst_58 : f32 to vector<2x128xf32>
    %194 = arith.mulf %193, %192 : vector<2x128xf32>
    %195 = math.tanh %194 : vector<2x128xf32>
    %cst_59 = arith.constant 1.000000e+00 : f32
    %196 = vector.broadcast %cst_59 : f32 to vector<2x128xf32>
    %197 = arith.addf %195, %196 : vector<2x128xf32>
    %cst_60 = arith.constant 5.000000e-01 : f32
    %198 = vector.broadcast %cst_60 : f32 to vector<2x128xf32>
    %199 = arith.mulf %198, %197 : vector<2x128xf32>
    %200 = math.tanh %192 : vector<2x128xf32>
    %201 = vector.extract_strided_slice %199 {offsets = [0, 0], sizes = [2, 32], strides = [1, 1]} : vector<2x128xf32> to vector<2x32xf32>
    %202 = vector.extract_strided_slice %199 {offsets = [0, 32], sizes = [2, 32], strides = [1, 1]} : vector<2x128xf32> to vector<2x32xf32>
    %203 = vector.extract_strided_slice %200 {offsets = [0, 64], sizes = [2, 32], strides = [1, 1]} : vector<2x128xf32> to vector<2x32xf32>
    %204 = vector.extract_strided_slice %199 {offsets = [0, 96], sizes = [2, 32], strides = [1, 1]} : vector<2x128xf32> to vector<2x32xf32>
    %205 = arith.mulf %202, %146 : vector<2x32xf32>
    %206 = arith.mulf %201, %203 : vector<2x32xf32>
    %207 = arith.addf %205, %206 : vector<2x32xf32>
    %208 = math.tanh %207 : vector<2x32xf32>
    %209 = arith.mulf %204, %208 : vector<2x32xf32>
    %210 = vector.extract_strided_slice %8 {offsets = [6, 0], sizes = [2, 128], strides = [1, 1]} : vector<16x128xf32> to vector<2x128xf32>
    %cst_61 = arith.constant dense<0.000000e+00> : vector<2x128xf32>
    %211 = tpu.matmul %169, %9, %cst_61 {dimension_numbers = #tpu.dot_dimension_numbers<[1], [0], [0], [1], [0, 0, 1, 1], [], []>} : vector<2x32xf32>, vector<32x128xf32>, vector<2x128xf32> -> vector<2x128xf32>
    %212 = arith.addf %210, %211 : vector<2x128xf32>
    %213 = arith.addf %212, %17 : vector<2x128xf32>
    %cst_62 = arith.constant 5.000000e-01 : f32
    %214 = vector.broadcast %cst_62 : f32 to vector<2x128xf32>
    %215 = arith.mulf %214, %213 : vector<2x128xf32>
    %216 = math.tanh %215 : vector<2x128xf32>
    %cst_63 = arith.constant 1.000000e+00 : f32
    %217 = vector.broadcast %cst_63 : f32 to vector<2x128xf32>
    %218 = arith.addf %216, %217 : vector<2x128xf32>
    %cst_64 = arith.constant 5.000000e-01 : f32
    %219 = vector.broadcast %cst_64 : f32 to vector<2x128xf32>
    %220 = arith.mulf %219, %218 : vector<2x128xf32>
    %221 = math.tanh %213 : vector<2x128xf32>
    %222 = vector.extract_strided_slice %220 {offsets = [0, 0], sizes = [2, 32], strides = [1, 1]} : vector<2x128xf32> to vector<2x32xf32>
    %223 = vector.extract_strided_slice %220 {offsets = [0, 32], sizes = [2, 32], strides = [1, 1]} : vector<2x128xf32> to vector<2x32xf32>
    %224 = vector.extract_strided_slice %221 {offsets = [0, 64], sizes = [2, 32], strides = [1, 1]} : vector<2x128xf32> to vector<2x32xf32>
    %225 = vector.extract_strided_slice %220 {offsets = [0, 96], sizes = [2, 32], strides = [1, 1]} : vector<2x128xf32> to vector<2x32xf32>
    %226 = arith.mulf %223, %167 : vector<2x32xf32>
    %227 = arith.mulf %222, %224 : vector<2x32xf32>
    %228 = arith.addf %226, %227 : vector<2x32xf32>
    %229 = math.tanh %228 : vector<2x32xf32>
    %230 = arith.mulf %225, %229 : vector<2x32xf32>
    %231 = tpu.concatenate %230, %189 in 1 : vector<2x32xf32>, vector<2x32xf32> -> vector<2x64xf32>
    %cst_65 = arith.constant dense<0.000000e+00> : vector<2x128xf32>
    %232 = tpu.matmul %231, %11, %cst_65 {dimension_numbers = #tpu.dot_dimension_numbers<[1], [0], [0], [1], [0, 0, 1, 1], [], []>} : vector<2x64xf32>, vector<64x128xf32>, vector<2x128xf32> -> vector<2x128xf32>
    %233 = arith.addf %232, %21 : vector<2x128xf32>
    %cst_66 = arith.constant 5.000000e-01 : f32
    %234 = vector.broadcast %cst_66 : f32 to vector<2x128xf32>
    %235 = arith.mulf %234, %233 : vector<2x128xf32>
    %236 = math.tanh %235 : vector<2x128xf32>
    %cst_67 = arith.constant 1.000000e+00 : f32
    %237 = vector.broadcast %cst_67 : f32 to vector<2x128xf32>
    %238 = arith.addf %236, %237 : vector<2x128xf32>
    %cst_68 = arith.constant 5.000000e-01 : f32
    %239 = vector.broadcast %cst_68 : f32 to vector<2x128xf32>
    %240 = arith.mulf %239, %238 : vector<2x128xf32>
    %241 = math.tanh %233 : vector<2x128xf32>
    %242 = vector.extract_strided_slice %240 {offsets = [0, 0], sizes = [2, 32], strides = [1, 1]} : vector<2x128xf32> to vector<2x32xf32>
    %243 = vector.extract_strided_slice %240 {offsets = [0, 32], sizes = [2, 32], strides = [1, 1]} : vector<2x128xf32> to vector<2x32xf32>
    %244 = vector.extract_strided_slice %241 {offsets = [0, 64], sizes = [2, 32], strides = [1, 1]} : vector<2x128xf32> to vector<2x32xf32>
    %245 = vector.extract_strided_slice %240 {offsets = [0, 96], sizes = [2, 32], strides = [1, 1]} : vector<2x128xf32> to vector<2x32xf32>
    %246 = arith.mulf %243, %187 : vector<2x32xf32>
    %247 = arith.mulf %242, %244 : vector<2x32xf32>
    %248 = arith.addf %246, %247 : vector<2x32xf32>
    %249 = math.tanh %248 : vector<2x32xf32>
    %250 = arith.mulf %245, %249 : vector<2x32xf32>
    %251 = tpu.concatenate %250, %209 in 1 : vector<2x32xf32>, vector<2x32xf32> -> vector<2x64xf32>
    %cst_69 = arith.constant dense<0.000000e+00> : vector<2x128xf32>
    %252 = tpu.matmul %251, %13, %cst_69 {dimension_numbers = #tpu.dot_dimension_numbers<[1], [0], [0], [1], [0, 0, 1, 1], [], []>} : vector<2x64xf32>, vector<64x128xf32>, vector<2x128xf32> -> vector<2x128xf32>
    %253 = arith.addf %252, %25 : vector<2x128xf32>
    %cst_70 = arith.constant 5.000000e-01 : f32
    %254 = vector.broadcast %cst_70 : f32 to vector<2x128xf32>
    %255 = arith.mulf %254, %253 : vector<2x128xf32>
    %256 = math.tanh %255 : vector<2x128xf32>
    %cst_71 = arith.constant 1.000000e+00 : f32
    %257 = vector.broadcast %cst_71 : f32 to vector<2x128xf32>
    %258 = arith.addf %256, %257 : vector<2x128xf32>
    %cst_72 = arith.constant 5.000000e-01 : f32
    %259 = vector.broadcast %cst_72 : f32 to vector<2x128xf32>
    %260 = arith.mulf %259, %258 : vector<2x128xf32>
    %261 = math.tanh %253 : vector<2x128xf32>
    %262 = vector.extract_strided_slice %260 {offsets = [0, 0], sizes = [2, 32], strides = [1, 1]} : vector<2x128xf32> to vector<2x32xf32>
    %263 = vector.extract_strided_slice %260 {offsets = [0, 32], sizes = [2, 32], strides = [1, 1]} : vector<2x128xf32> to vector<2x32xf32>
    %264 = vector.extract_strided_slice %261 {offsets = [0, 64], sizes = [2, 32], strides = [1, 1]} : vector<2x128xf32> to vector<2x32xf32>
    %265 = vector.extract_strided_slice %260 {offsets = [0, 96], sizes = [2, 32], strides = [1, 1]} : vector<2x128xf32> to vector<2x32xf32>
    %266 = arith.mulf %263, %207 : vector<2x32xf32>
    %267 = arith.mulf %262, %264 : vector<2x32xf32>
    %268 = arith.addf %266, %267 : vector<2x32xf32>
    %269 = math.tanh %268 : vector<2x32xf32>
    %270 = arith.mulf %265, %269 : vector<2x32xf32>
    %271 = vector.extract_strided_slice %8 {offsets = [8, 0], sizes = [2, 128], strides = [1, 1]} : vector<16x128xf32> to vector<2x128xf32>
    %cst_73 = arith.constant dense<0.000000e+00> : vector<2x128xf32>
    %272 = tpu.matmul %230, %9, %cst_73 {dimension_numbers = #tpu.dot_dimension_numbers<[1], [0], [0], [1], [0, 0, 1, 1], [], []>} : vector<2x32xf32>, vector<32x128xf32>, vector<2x128xf32> -> vector<2x128xf32>
    %273 = arith.addf %271, %272 : vector<2x128xf32>
    %274 = arith.addf %273, %17 : vector<2x128xf32>
    %cst_74 = arith.constant 5.000000e-01 : f32
    %275 = vector.broadcast %cst_74 : f32 to vector<2x128xf32>
    %276 = arith.mulf %275, %274 : vector<2x128xf32>
    %277 = math.tanh %276 : vector<2x128xf32>
    %cst_75 = arith.constant 1.000000e+00 : f32
    %278 = vector.broadcast %cst_75 : f32 to vector<2x128xf32>
    %279 = arith.addf %277, %278 : vector<2x128xf32>
    %cst_76 = arith.constant 5.000000e-01 : f32
    %280 = vector.broadcast %cst_76 : f32 to vector<2x128xf32>
    %281 = arith.mulf %280, %279 : vector<2x128xf32>
    %282 = math.tanh %274 : vector<2x128xf32>
    %283 = vector.extract_strided_slice %281 {offsets = [0, 0], sizes = [2, 32], strides = [1, 1]} : vector<2x128xf32> to vector<2x32xf32>
    %284 = vector.extract_strided_slice %281 {offsets = [0, 32], sizes = [2, 32], strides = [1, 1]} : vector<2x128xf32> to vector<2x32xf32>
    %285 = vector.extract_strided_slice %282 {offsets = [0, 64], sizes = [2, 32], strides = [1, 1]} : vector<2x128xf32> to vector<2x32xf32>
    %286 = vector.extract_strided_slice %281 {offsets = [0, 96], sizes = [2, 32], strides = [1, 1]} : vector<2x128xf32> to vector<2x32xf32>
    %287 = arith.mulf %284, %228 : vector<2x32xf32>
    %288 = arith.mulf %283, %285 : vector<2x32xf32>
    %289 = arith.addf %287, %288 : vector<2x32xf32>
    %290 = math.tanh %289 : vector<2x32xf32>
    %291 = arith.mulf %286, %290 : vector<2x32xf32>
    %292 = tpu.concatenate %291, %250 in 1 : vector<2x32xf32>, vector<2x32xf32> -> vector<2x64xf32>
    %cst_77 = arith.constant dense<0.000000e+00> : vector<2x128xf32>
    %293 = tpu.matmul %292, %11, %cst_77 {dimension_numbers = #tpu.dot_dimension_numbers<[1], [0], [0], [1], [0, 0, 1, 1], [], []>} : vector<2x64xf32>, vector<64x128xf32>, vector<2x128xf32> -> vector<2x128xf32>
    %294 = arith.addf %293, %21 : vector<2x128xf32>
    %cst_78 = arith.constant 5.000000e-01 : f32
    %295 = vector.broadcast %cst_78 : f32 to vector<2x128xf32>
    %296 = arith.mulf %295, %294 : vector<2x128xf32>
    %297 = math.tanh %296 : vector<2x128xf32>
    %cst_79 = arith.constant 1.000000e+00 : f32
    %298 = vector.broadcast %cst_79 : f32 to vector<2x128xf32>
    %299 = arith.addf %297, %298 : vector<2x128xf32>
    %cst_80 = arith.constant 5.000000e-01 : f32
    %300 = vector.broadcast %cst_80 : f32 to vector<2x128xf32>
    %301 = arith.mulf %300, %299 : vector<2x128xf32>
    %302 = math.tanh %294 : vector<2x128xf32>
    %303 = vector.extract_strided_slice %301 {offsets = [0, 0], sizes = [2, 32], strides = [1, 1]} : vector<2x128xf32> to vector<2x32xf32>
    %304 = vector.extract_strided_slice %301 {offsets = [0, 32], sizes = [2, 32], strides = [1, 1]} : vector<2x128xf32> to vector<2x32xf32>
    %305 = vector.extract_strided_slice %302 {offsets = [0, 64], sizes = [2, 32], strides = [1, 1]} : vector<2x128xf32> to vector<2x32xf32>
    %306 = vector.extract_strided_slice %301 {offsets = [0, 96], sizes = [2, 32], strides = [1, 1]} : vector<2x128xf32> to vector<2x32xf32>
    %307 = arith.mulf %304, %248 : vector<2x32xf32>
    %308 = arith.mulf %303, %305 : vector<2x32xf32>
    %309 = arith.addf %307, %308 : vector<2x32xf32>
    %310 = math.tanh %309 : vector<2x32xf32>
    %311 = arith.mulf %306, %310 : vector<2x32xf32>
    %312 = tpu.concatenate %311, %270 in 1 : vector<2x32xf32>, vector<2x32xf32> -> vector<2x64xf32>
    %cst_81 = arith.constant dense<0.000000e+00> : vector<2x128xf32>
    %313 = tpu.matmul %312, %13, %cst_81 {dimension_numbers = #tpu.dot_dimension_numbers<[1], [0], [0], [1], [0, 0, 1, 1], [], []>} : vector<2x64xf32>, vector<64x128xf32>, vector<2x128xf32> -> vector<2x128xf32>
    %314 = arith.addf %313, %25 : vector<2x128xf32>
    %cst_82 = arith.constant 5.000000e-01 : f32
    %315 = vector.broadcast %cst_82 : f32 to vector<2x128xf32>
    %316 = arith.mulf %315, %314 : vector<2x128xf32>
    %317 = math.tanh %316 : vector<2x128xf32>
    %cst_83 = arith.constant 1.000000e+00 : f32
    %318 = vector.broadcast %cst_83 : f32 to vector<2x128xf32>
    %319 = arith.addf %317, %318 : vector<2x128xf32>
    %cst_84 = arith.constant 5.000000e-01 : f32
    %320 = vector.broadcast %cst_84 : f32 to vector<2x128xf32>
    %321 = arith.mulf %320, %319 : vector<2x128xf32>
    %322 = math.tanh %314 : vector<2x128xf32>
    %323 = vector.extract_strided_slice %321 {offsets = [0, 0], sizes = [2, 32], strides = [1, 1]} : vector<2x128xf32> to vector<2x32xf32>
    %324 = vector.extract_strided_slice %321 {offsets = [0, 32], sizes = [2, 32], strides = [1, 1]} : vector<2x128xf32> to vector<2x32xf32>
    %325 = vector.extract_strided_slice %322 {offsets = [0, 64], sizes = [2, 32], strides = [1, 1]} : vector<2x128xf32> to vector<2x32xf32>
    %326 = vector.extract_strided_slice %321 {offsets = [0, 96], sizes = [2, 32], strides = [1, 1]} : vector<2x128xf32> to vector<2x32xf32>
    %327 = arith.mulf %324, %268 : vector<2x32xf32>
    %328 = arith.mulf %323, %325 : vector<2x32xf32>
    %329 = arith.addf %327, %328 : vector<2x32xf32>
    %330 = math.tanh %329 : vector<2x32xf32>
    %331 = arith.mulf %326, %330 : vector<2x32xf32>
    %332 = vector.extract_strided_slice %8 {offsets = [10, 0], sizes = [2, 128], strides = [1, 1]} : vector<16x128xf32> to vector<2x128xf32>
    %cst_85 = arith.constant dense<0.000000e+00> : vector<2x128xf32>
    %333 = tpu.matmul %291, %9, %cst_85 {dimension_numbers = #tpu.dot_dimension_numbers<[1], [0], [0], [1], [0, 0, 1, 1], [], []>} : vector<2x32xf32>, vector<32x128xf32>, vector<2x128xf32> -> vector<2x128xf32>
    %334 = arith.addf %332, %333 : vector<2x128xf32>
    %335 = arith.addf %334, %17 : vector<2x128xf32>
    %cst_86 = arith.constant 5.000000e-01 : f32
    %336 = vector.broadcast %cst_86 : f32 to vector<2x128xf32>
    %337 = arith.mulf %336, %335 : vector<2x128xf32>
    %338 = math.tanh %337 : vector<2x128xf32>
    %cst_87 = arith.constant 1.000000e+00 : f32
    %339 = vector.broadcast %cst_87 : f32 to vector<2x128xf32>
    %340 = arith.addf %338, %339 : vector<2x128xf32>
    %cst_88 = arith.constant 5.000000e-01 : f32
    %341 = vector.broadcast %cst_88 : f32 to vector<2x128xf32>
    %342 = arith.mulf %341, %340 : vector<2x128xf32>
    %343 = math.tanh %335 : vector<2x128xf32>
    %344 = vector.extract_strided_slice %342 {offsets = [0, 0], sizes = [2, 32], strides = [1, 1]} : vector<2x128xf32> to vector<2x32xf32>
    %345 = vector.extract_strided_slice %342 {offsets = [0, 32], sizes = [2, 32], strides = [1, 1]} : vector<2x128xf32> to vector<2x32xf32>
    %346 = vector.extract_strided_slice %343 {offsets = [0, 64], sizes = [2, 32], strides = [1, 1]} : vector<2x128xf32> to vector<2x32xf32>
    %347 = vector.extract_strided_slice %342 {offsets = [0, 96], sizes = [2, 32], strides = [1, 1]} : vector<2x128xf32> to vector<2x32xf32>
    %348 = arith.mulf %345, %289 : vector<2x32xf32>
    %349 = arith.mulf %344, %346 : vector<2x32xf32>
    %350 = arith.addf %348, %349 : vector<2x32xf32>
    %351 = math.tanh %350 : vector<2x32xf32>
    %352 = arith.mulf %347, %351 : vector<2x32xf32>
    %353 = tpu.concatenate %352, %311 in 1 : vector<2x32xf32>, vector<2x32xf32> -> vector<2x64xf32>
    %cst_89 = arith.constant dense<0.000000e+00> : vector<2x128xf32>
    %354 = tpu.matmul %353, %11, %cst_89 {dimension_numbers = #tpu.dot_dimension_numbers<[1], [0], [0], [1], [0, 0, 1, 1], [], []>} : vector<2x64xf32>, vector<64x128xf32>, vector<2x128xf32> -> vector<2x128xf32>
    %355 = arith.addf %354, %21 : vector<2x128xf32>
    %cst_90 = arith.constant 5.000000e-01 : f32
    %356 = vector.broadcast %cst_90 : f32 to vector<2x128xf32>
    %357 = arith.mulf %356, %355 : vector<2x128xf32>
    %358 = math.tanh %357 : vector<2x128xf32>
    %cst_91 = arith.constant 1.000000e+00 : f32
    %359 = vector.broadcast %cst_91 : f32 to vector<2x128xf32>
    %360 = arith.addf %358, %359 : vector<2x128xf32>
    %cst_92 = arith.constant 5.000000e-01 : f32
    %361 = vector.broadcast %cst_92 : f32 to vector<2x128xf32>
    %362 = arith.mulf %361, %360 : vector<2x128xf32>
    %363 = math.tanh %355 : vector<2x128xf32>
    %364 = vector.extract_strided_slice %362 {offsets = [0, 0], sizes = [2, 32], strides = [1, 1]} : vector<2x128xf32> to vector<2x32xf32>
    %365 = vector.extract_strided_slice %362 {offsets = [0, 32], sizes = [2, 32], strides = [1, 1]} : vector<2x128xf32> to vector<2x32xf32>
    %366 = vector.extract_strided_slice %363 {offsets = [0, 64], sizes = [2, 32], strides = [1, 1]} : vector<2x128xf32> to vector<2x32xf32>
    %367 = vector.extract_strided_slice %362 {offsets = [0, 96], sizes = [2, 32], strides = [1, 1]} : vector<2x128xf32> to vector<2x32xf32>
    %368 = arith.mulf %365, %309 : vector<2x32xf32>
    %369 = arith.mulf %364, %366 : vector<2x32xf32>
    %370 = arith.addf %368, %369 : vector<2x32xf32>
    %371 = math.tanh %370 : vector<2x32xf32>
    %372 = arith.mulf %367, %371 : vector<2x32xf32>
    %373 = tpu.concatenate %372, %331 in 1 : vector<2x32xf32>, vector<2x32xf32> -> vector<2x64xf32>
    %cst_93 = arith.constant dense<0.000000e+00> : vector<2x128xf32>
    %374 = tpu.matmul %373, %13, %cst_93 {dimension_numbers = #tpu.dot_dimension_numbers<[1], [0], [0], [1], [0, 0, 1, 1], [], []>} : vector<2x64xf32>, vector<64x128xf32>, vector<2x128xf32> -> vector<2x128xf32>
    %375 = arith.addf %374, %25 : vector<2x128xf32>
    %cst_94 = arith.constant 5.000000e-01 : f32
    %376 = vector.broadcast %cst_94 : f32 to vector<2x128xf32>
    %377 = arith.mulf %376, %375 : vector<2x128xf32>
    %378 = math.tanh %377 : vector<2x128xf32>
    %cst_95 = arith.constant 1.000000e+00 : f32
    %379 = vector.broadcast %cst_95 : f32 to vector<2x128xf32>
    %380 = arith.addf %378, %379 : vector<2x128xf32>
    %cst_96 = arith.constant 5.000000e-01 : f32
    %381 = vector.broadcast %cst_96 : f32 to vector<2x128xf32>
    %382 = arith.mulf %381, %380 : vector<2x128xf32>
    %383 = math.tanh %375 : vector<2x128xf32>
    %384 = vector.extract_strided_slice %382 {offsets = [0, 0], sizes = [2, 32], strides = [1, 1]} : vector<2x128xf32> to vector<2x32xf32>
    %385 = vector.extract_strided_slice %382 {offsets = [0, 32], sizes = [2, 32], strides = [1, 1]} : vector<2x128xf32> to vector<2x32xf32>
    %386 = vector.extract_strided_slice %383 {offsets = [0, 64], sizes = [2, 32], strides = [1, 1]} : vector<2x128xf32> to vector<2x32xf32>
    %387 = vector.extract_strided_slice %382 {offsets = [0, 96], sizes = [2, 32], strides = [1, 1]} : vector<2x128xf32> to vector<2x32xf32>
    %388 = arith.mulf %385, %329 : vector<2x32xf32>
    %389 = arith.mulf %384, %386 : vector<2x32xf32>
    %390 = arith.addf %388, %389 : vector<2x32xf32>
    %391 = math.tanh %390 : vector<2x32xf32>
    %392 = arith.mulf %387, %391 : vector<2x32xf32>
    %393 = vector.extract_strided_slice %8 {offsets = [12, 0], sizes = [2, 128], strides = [1, 1]} : vector<16x128xf32> to vector<2x128xf32>
    %cst_97 = arith.constant dense<0.000000e+00> : vector<2x128xf32>
    %394 = tpu.matmul %352, %9, %cst_97 {dimension_numbers = #tpu.dot_dimension_numbers<[1], [0], [0], [1], [0, 0, 1, 1], [], []>} : vector<2x32xf32>, vector<32x128xf32>, vector<2x128xf32> -> vector<2x128xf32>
    %395 = arith.addf %393, %394 : vector<2x128xf32>
    %396 = arith.addf %395, %17 : vector<2x128xf32>
    %cst_98 = arith.constant 5.000000e-01 : f32
    %397 = vector.broadcast %cst_98 : f32 to vector<2x128xf32>
    %398 = arith.mulf %397, %396 : vector<2x128xf32>
    %399 = math.tanh %398 : vector<2x128xf32>
    %cst_99 = arith.constant 1.000000e+00 : f32
    %400 = vector.broadcast %cst_99 : f32 to vector<2x128xf32>
    %401 = arith.addf %399, %400 : vector<2x128xf32>
    %cst_100 = arith.constant 5.000000e-01 : f32
    %402 = vector.broadcast %cst_100 : f32 to vector<2x128xf32>
    %403 = arith.mulf %402, %401 : vector<2x128xf32>
    %404 = math.tanh %396 : vector<2x128xf32>
    %405 = vector.extract_strided_slice %403 {offsets = [0, 0], sizes = [2, 32], strides = [1, 1]} : vector<2x128xf32> to vector<2x32xf32>
    %406 = vector.extract_strided_slice %403 {offsets = [0, 32], sizes = [2, 32], strides = [1, 1]} : vector<2x128xf32> to vector<2x32xf32>
    %407 = vector.extract_strided_slice %404 {offsets = [0, 64], sizes = [2, 32], strides = [1, 1]} : vector<2x128xf32> to vector<2x32xf32>
    %408 = vector.extract_strided_slice %403 {offsets = [0, 96], sizes = [2, 32], strides = [1, 1]} : vector<2x128xf32> to vector<2x32xf32>
    %409 = arith.mulf %406, %350 : vector<2x32xf32>
    %410 = arith.mulf %405, %407 : vector<2x32xf32>
    %411 = arith.addf %409, %410 : vector<2x32xf32>
    %412 = math.tanh %411 : vector<2x32xf32>
    %413 = arith.mulf %408, %412 : vector<2x32xf32>
    %414 = tpu.concatenate %413, %372 in 1 : vector<2x32xf32>, vector<2x32xf32> -> vector<2x64xf32>
    %cst_101 = arith.constant dense<0.000000e+00> : vector<2x128xf32>
    %415 = tpu.matmul %414, %11, %cst_101 {dimension_numbers = #tpu.dot_dimension_numbers<[1], [0], [0], [1], [0, 0, 1, 1], [], []>} : vector<2x64xf32>, vector<64x128xf32>, vector<2x128xf32> -> vector<2x128xf32>
    %416 = arith.addf %415, %21 : vector<2x128xf32>
    %cst_102 = arith.constant 5.000000e-01 : f32
    %417 = vector.broadcast %cst_102 : f32 to vector<2x128xf32>
    %418 = arith.mulf %417, %416 : vector<2x128xf32>
    %419 = math.tanh %418 : vector<2x128xf32>
    %cst_103 = arith.constant 1.000000e+00 : f32
    %420 = vector.broadcast %cst_103 : f32 to vector<2x128xf32>
    %421 = arith.addf %419, %420 : vector<2x128xf32>
    %cst_104 = arith.constant 5.000000e-01 : f32
    %422 = vector.broadcast %cst_104 : f32 to vector<2x128xf32>
    %423 = arith.mulf %422, %421 : vector<2x128xf32>
    %424 = math.tanh %416 : vector<2x128xf32>
    %425 = vector.extract_strided_slice %423 {offsets = [0, 0], sizes = [2, 32], strides = [1, 1]} : vector<2x128xf32> to vector<2x32xf32>
    %426 = vector.extract_strided_slice %423 {offsets = [0, 32], sizes = [2, 32], strides = [1, 1]} : vector<2x128xf32> to vector<2x32xf32>
    %427 = vector.extract_strided_slice %424 {offsets = [0, 64], sizes = [2, 32], strides = [1, 1]} : vector<2x128xf32> to vector<2x32xf32>
    %428 = vector.extract_strided_slice %423 {offsets = [0, 96], sizes = [2, 32], strides = [1, 1]} : vector<2x128xf32> to vector<2x32xf32>
    %429 = arith.mulf %426, %370 : vector<2x32xf32>
    %430 = arith.mulf %425, %427 : vector<2x32xf32>
    %431 = arith.addf %429, %430 : vector<2x32xf32>
    %432 = math.tanh %431 : vector<2x32xf32>
    %433 = arith.mulf %428, %432 : vector<2x32xf32>
    %434 = tpu.concatenate %433, %392 in 1 : vector<2x32xf32>, vector<2x32xf32> -> vector<2x64xf32>
    %cst_105 = arith.constant dense<0.000000e+00> : vector<2x128xf32>
    %435 = tpu.matmul %434, %13, %cst_105 {dimension_numbers = #tpu.dot_dimension_numbers<[1], [0], [0], [1], [0, 0, 1, 1], [], []>} : vector<2x64xf32>, vector<64x128xf32>, vector<2x128xf32> -> vector<2x128xf32>
    %436 = arith.addf %435, %25 : vector<2x128xf32>
    %cst_106 = arith.constant 5.000000e-01 : f32
    %437 = vector.broadcast %cst_106 : f32 to vector<2x128xf32>
    %438 = arith.mulf %437, %436 : vector<2x128xf32>
    %439 = math.tanh %438 : vector<2x128xf32>
    %cst_107 = arith.constant 1.000000e+00 : f32
    %440 = vector.broadcast %cst_107 : f32 to vector<2x128xf32>
    %441 = arith.addf %439, %440 : vector<2x128xf32>
    %cst_108 = arith.constant 5.000000e-01 : f32
    %442 = vector.broadcast %cst_108 : f32 to vector<2x128xf32>
    %443 = arith.mulf %442, %441 : vector<2x128xf32>
    %444 = math.tanh %436 : vector<2x128xf32>
    %445 = vector.extract_strided_slice %443 {offsets = [0, 0], sizes = [2, 32], strides = [1, 1]} : vector<2x128xf32> to vector<2x32xf32>
    %446 = vector.extract_strided_slice %443 {offsets = [0, 32], sizes = [2, 32], strides = [1, 1]} : vector<2x128xf32> to vector<2x32xf32>
    %447 = vector.extract_strided_slice %444 {offsets = [0, 64], sizes = [2, 32], strides = [1, 1]} : vector<2x128xf32> to vector<2x32xf32>
    %448 = vector.extract_strided_slice %443 {offsets = [0, 96], sizes = [2, 32], strides = [1, 1]} : vector<2x128xf32> to vector<2x32xf32>
    %449 = arith.mulf %446, %390 : vector<2x32xf32>
    %450 = arith.mulf %445, %447 : vector<2x32xf32>
    %451 = arith.addf %449, %450 : vector<2x32xf32>
    %452 = math.tanh %451 : vector<2x32xf32>
    %453 = arith.mulf %448, %452 : vector<2x32xf32>
    %454 = vector.extract_strided_slice %8 {offsets = [14, 0], sizes = [2, 128], strides = [1, 1]} : vector<16x128xf32> to vector<2x128xf32>
    %cst_109 = arith.constant dense<0.000000e+00> : vector<2x128xf32>
    %455 = tpu.matmul %413, %9, %cst_109 {dimension_numbers = #tpu.dot_dimension_numbers<[1], [0], [0], [1], [0, 0, 1, 1], [], []>} : vector<2x32xf32>, vector<32x128xf32>, vector<2x128xf32> -> vector<2x128xf32>
    %456 = arith.addf %454, %455 : vector<2x128xf32>
    %457 = arith.addf %456, %17 : vector<2x128xf32>
    %cst_110 = arith.constant 5.000000e-01 : f32
    %458 = vector.broadcast %cst_110 : f32 to vector<2x128xf32>
    %459 = arith.mulf %458, %457 : vector<2x128xf32>
    %460 = math.tanh %459 : vector<2x128xf32>
    %cst_111 = arith.constant 1.000000e+00 : f32
    %461 = vector.broadcast %cst_111 : f32 to vector<2x128xf32>
    %462 = arith.addf %460, %461 : vector<2x128xf32>
    %cst_112 = arith.constant 5.000000e-01 : f32
    %463 = vector.broadcast %cst_112 : f32 to vector<2x128xf32>
    %464 = arith.mulf %463, %462 : vector<2x128xf32>
    %465 = math.tanh %457 : vector<2x128xf32>
    %466 = vector.extract_strided_slice %464 {offsets = [0, 0], sizes = [2, 32], strides = [1, 1]} : vector<2x128xf32> to vector<2x32xf32>
    %467 = vector.extract_strided_slice %464 {offsets = [0, 32], sizes = [2, 32], strides = [1, 1]} : vector<2x128xf32> to vector<2x32xf32>
    %468 = vector.extract_strided_slice %465 {offsets = [0, 64], sizes = [2, 32], strides = [1, 1]} : vector<2x128xf32> to vector<2x32xf32>
    %469 = vector.extract_strided_slice %464 {offsets = [0, 96], sizes = [2, 32], strides = [1, 1]} : vector<2x128xf32> to vector<2x32xf32>
    %470 = arith.mulf %467, %411 : vector<2x32xf32>
    %471 = arith.mulf %466, %468 : vector<2x32xf32>
    %472 = arith.addf %470, %471 : vector<2x32xf32>
    %473 = math.tanh %472 : vector<2x32xf32>
    %474 = arith.mulf %469, %473 : vector<2x32xf32>
    %475 = tpu.concatenate %474, %433 in 1 : vector<2x32xf32>, vector<2x32xf32> -> vector<2x64xf32>
    %cst_113 = arith.constant dense<0.000000e+00> : vector<2x128xf32>
    %476 = tpu.matmul %475, %11, %cst_113 {dimension_numbers = #tpu.dot_dimension_numbers<[1], [0], [0], [1], [0, 0, 1, 1], [], []>} : vector<2x64xf32>, vector<64x128xf32>, vector<2x128xf32> -> vector<2x128xf32>
    %477 = arith.addf %476, %21 : vector<2x128xf32>
    %cst_114 = arith.constant 5.000000e-01 : f32
    %478 = vector.broadcast %cst_114 : f32 to vector<2x128xf32>
    %479 = arith.mulf %478, %477 : vector<2x128xf32>
    %480 = math.tanh %479 : vector<2x128xf32>
    %cst_115 = arith.constant 1.000000e+00 : f32
    %481 = vector.broadcast %cst_115 : f32 to vector<2x128xf32>
    %482 = arith.addf %480, %481 : vector<2x128xf32>
    %cst_116 = arith.constant 5.000000e-01 : f32
    %483 = vector.broadcast %cst_116 : f32 to vector<2x128xf32>
    %484 = arith.mulf %483, %482 : vector<2x128xf32>
    %485 = math.tanh %477 : vector<2x128xf32>
    %486 = vector.extract_strided_slice %484 {offsets = [0, 0], sizes = [2, 32], strides = [1, 1]} : vector<2x128xf32> to vector<2x32xf32>
    %487 = vector.extract_strided_slice %484 {offsets = [0, 32], sizes = [2, 32], strides = [1, 1]} : vector<2x128xf32> to vector<2x32xf32>
    %488 = vector.extract_strided_slice %485 {offsets = [0, 64], sizes = [2, 32], strides = [1, 1]} : vector<2x128xf32> to vector<2x32xf32>
    %489 = vector.extract_strided_slice %484 {offsets = [0, 96], sizes = [2, 32], strides = [1, 1]} : vector<2x128xf32> to vector<2x32xf32>
    %490 = arith.mulf %487, %431 : vector<2x32xf32>
    %491 = arith.mulf %486, %488 : vector<2x32xf32>
    %492 = arith.addf %490, %491 : vector<2x32xf32>
    %493 = math.tanh %492 : vector<2x32xf32>
    %494 = arith.mulf %489, %493 : vector<2x32xf32>
    %495 = tpu.concatenate %494, %453 in 1 : vector<2x32xf32>, vector<2x32xf32> -> vector<2x64xf32>
    %cst_117 = arith.constant dense<0.000000e+00> : vector<2x128xf32>
    %496 = tpu.matmul %495, %13, %cst_117 {dimension_numbers = #tpu.dot_dimension_numbers<[1], [0], [0], [1], [0, 0, 1, 1], [], []>} : vector<2x64xf32>, vector<64x128xf32>, vector<2x128xf32> -> vector<2x128xf32>
    %497 = arith.addf %496, %25 : vector<2x128xf32>
    %cst_118 = arith.constant 5.000000e-01 : f32
    %498 = vector.broadcast %cst_118 : f32 to vector<2x128xf32>
    %499 = arith.mulf %498, %497 : vector<2x128xf32>
    %500 = math.tanh %499 : vector<2x128xf32>
    %cst_119 = arith.constant 1.000000e+00 : f32
    %501 = vector.broadcast %cst_119 : f32 to vector<2x128xf32>
    %502 = arith.addf %500, %501 : vector<2x128xf32>
    %cst_120 = arith.constant 5.000000e-01 : f32
    %503 = vector.broadcast %cst_120 : f32 to vector<2x128xf32>
    %504 = arith.mulf %503, %502 : vector<2x128xf32>
    %505 = math.tanh %497 : vector<2x128xf32>
    %506 = vector.extract_strided_slice %504 {offsets = [0, 0], sizes = [2, 32], strides = [1, 1]} : vector<2x128xf32> to vector<2x32xf32>
    %507 = vector.extract_strided_slice %504 {offsets = [0, 32], sizes = [2, 32], strides = [1, 1]} : vector<2x128xf32> to vector<2x32xf32>
    %508 = vector.extract_strided_slice %505 {offsets = [0, 64], sizes = [2, 32], strides = [1, 1]} : vector<2x128xf32> to vector<2x32xf32>
    %509 = vector.extract_strided_slice %504 {offsets = [0, 96], sizes = [2, 32], strides = [1, 1]} : vector<2x128xf32> to vector<2x32xf32>
    %510 = arith.mulf %507, %451 : vector<2x32xf32>
    %511 = arith.mulf %506, %508 : vector<2x32xf32>
    %512 = arith.addf %510, %511 : vector<2x32xf32>
    %513 = math.tanh %512 : vector<2x32xf32>
    %514 = arith.mulf %509, %513 : vector<2x32xf32>
    %c0_121 = arith.constant 0 : index
    %c0_122 = arith.constant 0 : index
    %515 = vector.load %arg8[%c0_121, %c0_122] : memref<32x12xf32, #tpu.memory_space<vmem>>, vector<32x12xf32>
    %cst_123 = arith.constant dense<0.000000e+00> : vector<2x12xf32>
    %516 = tpu.matmul %514, %515, %cst_123 {dimension_numbers = #tpu.dot_dimension_numbers<[1], [0], [0], [1], [0, 0, 1, 1], [], []>} : vector<2x32xf32>, vector<32x12xf32>, vector<2x12xf32> -> vector<2x12xf32>
    %c0_124 = arith.constant 0 : index
    %c0_125 = arith.constant 0 : index
    %517 = vector.load %arg9[%c0_124, %c0_125] : memref<1x12xf32, #tpu.memory_space<vmem>>, vector<1x12xf32>
    %518 = vector.broadcast %517 : vector<1x12xf32> to vector<2x12xf32>
    %519 = arith.addf %516, %518 : vector<2x12xf32>
    %c0_126 = arith.constant 0 : index
    %c0_127 = arith.constant 0 : index
    %520 = vector.load %arg10[%c0_126, %c0_127] : memref<2x12xf32, #tpu.memory_space<vmem>>, vector<2x12xf32>
    tpu.vector_store %arg10[%c0_126, %c0_127], %519 {strides = array<i32>} : memref<2x12xf32, #tpu.memory_space<vmem>>, vector<2x12xf32>,
    return
  }
  func.func @transform_0(%arg0: i32) -> (i32, i32, i32) {
    %c0_i32 = arith.constant 0 : i32
    %c0_i32_0 = arith.constant 0 : i32
    %c0_i32_1 = arith.constant 0 : i32
    return %c0_i32, %arg0, %c0_i32_0 : i32, i32, i32
  }
  func.func @transform_1(%arg0: i32) -> (i32, i32) {
    %c0_i32 = arith.constant 0 : i32
    %c0_i32_0 = arith.constant 0 : i32
    %c0_i32_1 = arith.constant 0 : i32
    return %c0_i32, %c0_i32_0 : i32, i32
  }
  func.func @transform_2(%arg0: i32) -> (i32, i32) {
    %c0_i32 = arith.constant 0 : i32
    %c0_i32_0 = arith.constant 0 : i32
    %c0_i32_1 = arith.constant 0 : i32
    return %c0_i32, %c0_i32_0 : i32, i32
  }
  func.func @transform_3(%arg0: i32) -> (i32, i32) {
    %c0_i32 = arith.constant 0 : i32
    %c0_i32_0 = arith.constant 0 : i32
    %c0_i32_1 = arith.constant 0 : i32
    return %c0_i32, %c0_i32_0 : i32, i32
  }
  func.func @transform_4(%arg0: i32) -> (i32, i32) {
    %c0_i32 = arith.constant 0 : i32
    %c0_i32_0 = arith.constant 0 : i32
    %c0_i32_1 = arith.constant 0 : i32
    return %c0_i32, %c0_i32_0 : i32, i32
  }
  func.func @transform_5(%arg0: i32) -> (i32, i32, i32) {
    %c0_i32 = arith.constant 0 : i32
    %c0_i32_0 = arith.constant 0 : i32
    %c0_i32_1 = arith.constant 0 : i32
    %c0_i32_2 = arith.constant 0 : i32
    return %c0_i32, %c0_i32_0, %c0_i32_1 : i32, i32, i32
  }
  func.func @transform_6(%arg0: i32) -> (i32, i32, i32) {
    %c0_i32 = arith.constant 0 : i32
    %c0_i32_0 = arith.constant 0 : i32
    %c0_i32_1 = arith.constant 0 : i32
    %c0_i32_2 = arith.constant 0 : i32
    return %c0_i32, %c0_i32_0, %c0_i32_1 : i32, i32, i32
  }
  func.func @transform_7(%arg0: i32) -> (i32, i32) {
    %c0_i32 = arith.constant 0 : i32
    %c0_i32_0 = arith.constant 0 : i32
    %c0_i32_1 = arith.constant 0 : i32
    return %c0_i32, %c0_i32_0 : i32, i32
  }
  func.func @transform_8(%arg0: i32) -> (i32, i32) {
    %c0_i32 = arith.constant 0 : i32
    %c0_i32_0 = arith.constant 0 : i32
    %c0_i32_1 = arith.constant 0 : i32
    return %c0_i32, %c0_i32_0 : i32, i32
  }
  func.func @transform_9(%arg0: i32) -> (i32, i32) {
    %c0_i32 = arith.constant 0 : i32
    %c0_i32_0 = arith.constant 0 : i32
    return %arg0, %c0_i32 : i32, i32
  }
}

</mosaic_0001>

<bundles_post_ra>
// kernel: tpu_custom_call.1
= control target key start
LH: loop header
LB: loop body
LE: loop exit
PB: predicated region body
PF: predicated region fallthrough
CT: control target
= control target key end

     0   :  { %14 = vsyncpa [#allocation3], 0  ;;  %s4783_s0 = inlined_call_operand.vmem [shape: f32[8,2,2], index: 0, kind: input, shape index: {}]   ;;  %s4784_s1 = inlined_call_operand.hbm [shape: f32[2,32], index: 1, kind: input, shape index: {}]   ;;  %s4785_s2 = inlined_call_operand.hbm [shape: f32[1,32], index: 2, kind: input, shape index: {}]   ;;  %s4786_s3 = inlined_call_operand.vmem [shape: f32[32,128], index: 3, kind: input, shape index: {}]   ;;  %s4787_s4 = inlined_call_operand.vmem [shape: f32[32,128], index: 4, kind: input, shape index: {}]   ;;  %s4788_s5 = inlined_call_operand.hbm [shape: f32[2,64,128], index: 5, kind: input, shape index: {}]   ;;  %s4789_s6 = inlined_call_operand.hbm [shape: f32[3,1,128], index: 6, kind: input, shape index: {}]   ;;  %s4790_s7 = inlined_call_operand.vmem [shape: f32[32,12], index: 7, kind: input, shape index: {}]   ;;  %s4791_s8 = inlined_call_operand.vmem [shape: f32[1,12], index: 8, kind: input, shape index: {}]   ;;  %s4792_s9 = inlined_call_operand.hbm [shape: f32[2,12], index: 9, kind: output, shape index: {}]  }
   0x1   :  { %15 = vsyncpa [#allocation6], 0 }
   0x2   :  { %16 = vsyncpa [#allocation9], 0 }
   0x3   :  { %17 = vsyncpa [#allocation4], 0  ;;  %s3886_s30 = smov [#allocation5]   ;;  %s3887_s11 = smov [#allocation2]  }
   0x4   :  { %s36_s10 = sshll.u32 %s3886_s30, 4  ;;  %s26_s12 = sshll.u32 %s3887_s11, 4  ;;  %s37_s10 = int_to_ptr.vmem [resolvable:$true] %s36_s10  ;;  %s27_s12 = int_to_ptr.vmem [resolvable:$true] %s26_s12 }
   0x5   :  { %s3786_s13 = scalar_lea.vmem %s37_s10, 16  ;;  %s3790_s14 = scalar_lea.vmem %s37_s10, 32 }
   0x6   :  { %p3787_p0 = scmp.ne.s32.totalorder %s37_s10, %s3786_s13  ;;  %p3791_p1 = scmp.lt.s32.totalorder %s37_s10, %s37_s10 }
   0x7   :  { %p3792_p2 = scmp.lt.s32.totalorder %s3790_s14, %s3786_s13 }
   0x9   :  { %p3793_p3 = por %p3792_p2, %p3791_p1 }
   0xb   :  { %p3794_p4 = pnand %p3793_p3, %p3787_p0 }
   0xd   :  { %3797 = shalt.err (!%p3794_p4)
}
   0xe   :  { %39 = dma.hbm_to_vmem [thread:$0]  %s4785_s2, 16, %s37_s10, [#allocation6]  }
   0xf   :  { %s3806_s17 = scalar_lea.vmem %s27_s12, 32  ;;  %p3811_p6 = scmp.lt.s32.totalorder %s27_s12, %s27_s12 }
  0x10   :  { %p3807_p5 = scmp.ne.s32.totalorder %s27_s12, %s3806_s17  ;;  %p3812_p7 = scmp.lt.s32.totalorder %s3806_s17, %s3806_s17 }
  0x12   :  { %p3813_p8 = por %p3812_p7, %p3811_p6 }
  0x14   :  { %p3814_p9 = pnand %p3813_p8, %p3807_p5 }
  0x16   :  { %3817 = shalt.err (!%p3814_p9)
}
  0x17   :  { %29 = dma.hbm_to_vmem [thread:$0]  %s4784_s1, 32, %s27_s12, [#allocation3]  }
  0x18   :  { %s3888_s20 = smov [#allocation7]  }
  0x19   :  { %s49_s21 = sshll.u32 %s3888_s20, 4  ;;  %s50_s21 = int_to_ptr.vmem [resolvable:$true] %s49_s21 }
  0x1a   :  { %s3826_s22 = scalar_lea.vmem %s50_s21, 2048  ;;  %p3831_p11 = scmp.lt.s32.totalorder %s50_s21, %s50_s21 }
  0x1b   :  { %p3827_p10 = scmp.ne.s32.totalorder %s50_s21, %s3826_s22  ;;  %p3832_p12 = scmp.lt.s32.totalorder %s3826_s22, %s3826_s22 }
  0x1d   :  { %p3833_p13 = por %p3832_p12, %p3831_p11 }
  0x1f   :  { %p3834_p0 = pnand %p3833_p13, %p3827_p10 }
  0x21   :  { %3837 = shalt.err (!%p3834_p0)
}
  0x22   :  { %s3889_s2 = smov 128   ;;  %s3890_s23 = smov 8  }
  0x23   :  { %55 = dma.hbm_to_vmem [thread:$0]  %s4788_s5, 2048, %s50_s21, [#allocation6], %s3889_s2, %s3889_s2, %s3890_s23  }
  0x24   :  { %s3891_s26 = smov [#allocation8]  }
  0x25   :  { %s61_s27 = sshll.u32 %s3891_s26, 4  ;;  %s62_s27 = int_to_ptr.vmem [resolvable:$true] %s61_s27 }
  0x26   :  { %s3846_s1 = scalar_lea.vmem %s62_s27, 48  ;;  %s3850_s28 = scalar_lea.vmem %s62_s27, 64 }
  0x27   :  { %p3847_p1 = scmp.ne.s32.totalorder %s62_s27, %s3846_s1  ;;  %p3851_p2 = scmp.lt.s32.totalorder %s62_s27, %s62_s27 }
  0x28   :  { %p3852_p3 = scmp.lt.s32.totalorder %s3850_s28, %s3846_s1 }
  0x2a   :  { %p3853_p4 = por %p3852_p3, %p3851_p2 }
  0x2c   :  { %p3854_p5 = pnand %p3853_p4, %p3847_p1 }
  0x2e   :  { %3857 = shalt.err (!%p3854_p5)
}
  0x2f   :  { %s3892_s29 = smov 16   ;;  %s3893_s30 = smov 1  }
  0x30   :  { %67 = dma.hbm_to_vmem [thread:$0]  %s4789_s6, 48, %s62_s27, [#allocation9], %s3892_s29, %s3892_s29, %s3893_s30  }
  0x31   :  { %3878 = dma.done.wait [#allocation3], 32  }
  0x32   :  { %3879 = vsyncadd [#allocation3], 4294967264 }
  0x33   :  { %3880 = dma.done.wait [#allocation6], 2064  }
  0x34   :  { %3881 = vsyncadd [#allocation6], 4294965232 }
  0x35   :  { %3882 = dma.done.wait [#allocation9], 48  }
  0x36   :  { %3883 = vsyncadd [#allocation9], 4294967248  ;;  %v113_v0 = vlaneseq  ;;  %v3894_v1 = vmov 1983009808   ;;  %vm147_vm0 = vcmask 1041408   ;;  %v229_v20 = vld [vmem:[%s4786_s3 + $0x18] sm:$0xff] }
  0x37   :  { %v111_v2 = vunpack.c.l.s4 %v3894_v1  ;;  %v92_v6 = vld [vmem:[#allocation2] sm:$0x3]  ;;  %v85_v8 = vld [vmem:[%s4783_s0 + $0x2] sm:$0x3]  ;;  %v86_v9 = vld [vmem:[%s4783_s0 + $0x4] sm:$0x3]  ;;  %3183 = vmatprep.subr.mxu1 %v229_v20 }
  0x38   :  { %v114_v3 = vshrl.u32 %v113_v0, 7  ;;  %v84_v7 = vld [vmem:[%s4783_s0] sm:$0x3]  ;;  %3178 = vmatprep.subr.msk.mxu0 %vm147_vm0, %v92_v6  ;;  %v87_v10 = vld [vmem:[%s4783_s0 + $0x6] sm:$0x3]  ;;  %v3895_v21 = vmov 0.0   ;;  %3184 = vmatpush3.msra.mxu1 %v229_v20 }
  0x39   :  { %v112_v4 = vunpack.c.0.s8 %v111_v2  ;;  %v108_v11 = vcombine.low %v84_v7, %v85_v8  ;;  %v88_v12 = vld [vmem:[%s4783_s0 + $0x8] sm:$0x3]  ;;  %3179 = vmatpush3.msk.msra.mxu0 %vm147_vm0, %v92_v6  ;;  %v109_v13 = vcombine.low %v86_v9, %v87_v10  ;;  %v89_v14 = vld [vmem:[%s4783_s0 + $0xa] sm:$0x3]  ;;  %v90_v15 = vld [vmem:[%s4783_s0 + $0xc] sm:$0x3] }
  0x3a   :  { %v91_v16 = vld [vmem:[%s4783_s0 + $0xe] sm:$0x3]  ;;  %v125_v18 = vcombine.low %v88_v12, %v89_v14  ;;  %3194 = vmatprep.subr.mxu0 %v3895_v21  ;;  %vm142_vm1 = vcmask 15360   ;;  %v3993_v27 = vld [vmem:[%s4787_s4 + $0x18] sm:$0xff]  ;;  %v228_v28 = vld [vmem:[%s4786_s3 + $0x10] sm:$0xff]  ;;  %vm3896_vm2 = vmmov 0  }
  0x3b   :  { %v115_v5 = vsub.s32 %v112_v4, %v114_v3  ;;  %v126_v19 = vcombine.low %v90_v15, %v91_v16  ;;  %3185 = vmatprep.subr.mxu1 %v228_v28  ;;  %v4003_v29 = vld [vmem:[%s4787_s4 + $0x10] sm:$0xff]  ;;  %v227_v30 = vld [vmem:[%s4786_s3 + $0x8] sm:$0xff]  ;;  %v226_v32 = vld [vmem:[%s4786_s3] sm:$0xff]  ;;  %vm230_vm3 = vcmask 261120   ;;  %s3897_s3 = smov 64   ;;  %s3898_s16 = smov 32  }
  0x3c   :  { %3186 = vmatpush3.msra.mxu1 %v228_v28  ;;  %v4013_v31 = vld [vmem:[%s4787_s4 + $0x8] sm:$0xff]  ;;  %v4023_v33 = vld [vmem:[%s4787_s4] sm:$0xff]  ;;  %v4052_v57 = vld [vmem:[#allocation7 + $0x30] sm:$0xff]  ;;  %vm458_vm4 = vcmask 523264   ;;  %s3899_s10 = smov [#allocation10]   ;;  %vm2927_vm5 = vcmask 91136  }
  0x3d   :  { %v116_v17 = vrot.slane %v108_v11, %v115_v5  ;;  %v123_v22 = vrot.slane %v109_v13, %v115_v5  ;;  %v133_v23 = vrot.slane %v125_v18, %v115_v5  ;;  %v140_v24 = vrot.slane %v126_v19, %v115_v5  ;;  %3187 = vmatprep.subr.mxu1 %v227_v30  ;;  %v2946_v35 = vld [vmem:[#allocation5] ss:$0 sm:$0xff]  ;;  %v4041_v43 = vld [vmem:[#allocation8] ss:$0 sm:$0xff]  ;;  %v4056_v58 = vld [vmem:[#allocation7 + $0x28] sm:$0xff] }
  0x3e   :  { %3188 = vmatpush3.msra.mxu1 %v227_v30  ;;  %v4050_v56 = vld [vmem:[#allocation7 + $0x38] sm:$0xff]  ;;  %v4060_v59 = vld [vmem:[#allocation7 + $0x20] sm:$0xff]  ;;  %v4068_v61 = vld [vmem:[#allocation7 + $0x10] sm:$0xff] }
  0x3f   :  { %v124_v25 = vcombine.low %v116_v17, %v123_v22  ;;  %v141_v26 = vcombine.low %v133_v23, %v140_v24  ;;  %3189 = vmatprep.subr.mxu1 %v226_v32  ;;  %v4064_v60 = vld [vmem:[#allocation7 + $0x18] sm:$0xff]  ;;  %v4072_v63 = vld [vmem:[#allocation7 + $0x8] sm:$0xff]  ;;  %v4077_v0 = vld [vmem:[#allocation7] sm:$0xff] }
  0x40   :  { %3190 = vmatpush3.msra.mxu1 %v226_v32  ;;  %v4099_v5 = vld [vmem:[#allocation8 + $0x1] ss:$0 sm:$0xff] }
  0x41   :  { %3180 = vmatprep.mubr.msk.f32.mxu0 %vm142_vm1, %v124_v25  ;;  %3205 = vmatprep.subr.mxu1 %v3895_v21 }
  0x42   :  { %3181 = vmatmul.mubr.msk.f32.vlgmr.msra.gmra.mxu0 %vm142_vm1, %v141_v26 }
  0x43   :  { %3195 = vmatpush3.msra.mxu0 %v3993_v27  ;;  %3202 = vmatprep.mubr.msk.f32.mxu0 %vm3896_vm2, %v3895_v21 }
  0x44   :  { %3196 = vmatprep.subr.mxu0 %v3895_v21 }
  0x45   :  { %3197 = vmatpush3.msra.mxu0 %v4003_v29 }
  0x46   :  { %3198 = vmatprep.subr.mxu0 %v3895_v21 }
  0x47   :  { %3199 = vmatpush3.msra.mxu0 %v4013_v31 }
  0x48   :  { %3200 = vmatprep.subr.mxu0 %v3895_v21 }
  0x49   :  { %3201 = vmatpush3.msra.mxu0 %v4023_v33 }
  0x4a   :  { %3203 = vmatmul.mubr.f32.vlgmr.msra.gmra.mxu0 %v3895_v21  ;;  %3224 = vmatprep.subr.mxu0 %v3895_v21 }
  0x4b   :  { %3240 = vmatprep.mubr.msk.f32.mxu0 %vm3896_vm2, %v3895_v21 }
 0x102   :  { %v3182_v34 = vpop.f32.mrf.mxu0 }
 0x103   :  { %v223_v38 = vadd.f32 %v3182_v34, %v2946_v35 }
 0x104   :  { %v217_v36 = vpop.f32.mrf.mxu0 }
 0x105   :  { %v218_v37 = vadd.f32 %v2946_v35, %v217_v36 }
 0x107   :  { %3191 = vmatprep.mubr.msk.f32.mxu1 %vm230_vm3, %v218_v37 }
 0x108   :  { %3192 = vmatmul.mubr.msk.f32.vlgmr.msra.gmra.mxu1 %vm230_vm3, %v223_v38 }
 0x109   :  { %3221 = vmatprep.mubr.msk.f32.mxu1 %vm3896_vm2, %v3895_v21  ;;  %3206 = vmatpush3.msra.mxu1 %v4050_v56 }
 0x10a   :  { %v425_v39 = vpop.f32.mrf.mxu0  ;;  %3207 = vmatprep.subr.mxu1 %v3895_v21 }
 0x10b   :  { %3208 = vmatpush3.msra.mxu1 %v4052_v57 }
 0x10c   :  { %v3204_v40 = vpop.f32.mrf.mxu0  ;;  %3209 = vmatprep.subr.mxu1 %v3895_v21 }
 0x10d   :  { %3210 = vmatpush3.msra.mxu1 %v4056_v58 }
 0x10e   :  { %3211 = vmatprep.subr.mxu1 %v3895_v21 }
 0x10f   :  { %3212 = vmatpush3.msra.mxu1 %v4060_v59 }
 0x110   :  { %3213 = vmatprep.subr.mxu1 %v3895_v21 }
 0x111   :  { %3214 = vmatpush3.msra.mxu1 %v4064_v60 }
 0x112   :  { %3215 = vmatprep.subr.mxu1 %v3895_v21 }
 0x113   :  { %3216 = vmatpush3.msra.mxu1 %v4068_v61 }
 0x114   :  { %3217 = vmatprep.subr.mxu1 %v3895_v21 }
 0x115   :  { %3218 = vmatpush3.msra.mxu1 %v4072_v63 }
 0x116   :  { %3219 = vmatprep.subr.mxu1 %v3895_v21 }
 0x117   :  { %3220 = vmatpush3.msra.mxu1 %v4077_v0 }
 0x118   :  { %3243 = vmatprep.subr.mxu1 %v3895_v21 }
 0x1c8   :  { %v4037_v41 = vpop.f32.mrf.mxu1 }
 0x1ca   :  { %v4039_v42 = vpop.f32.mrf.mxu1 }
 0x1cb   :  { %v429_v44 = vadd.f32 %v425_v39, %v4039_v42 }
 0x1cd   :  { %v430_v45 = vadd.f32 %v4041_v43, %v429_v44  ;;  %v4124_v44 = vld [vmem:[#allocation7 + $0x78] sm:$0xff] }
 0x1ce   :  { %3225 = vmatpush3.msra.mxu0 %v4124_v44 }
 0x1cf   :  { %3611 = vtanh.f32 %v430_v45  ;;  %v431_v47 = vmul.f32 0.5, %v430_v45  ;;  %v4126_v45 = vld [vmem:[#allocation7 + $0x70] sm:$0xff]  ;;  %3226 = vmatprep.subr.mxu0 %v3895_v21 }
 0x1d0   :  { %3227 = vmatpush3.msra.mxu0 %v4126_v45 }
 0x1d1   :  { %3613 = vtanh.f32 %v431_v47  ;;  %3228 = vmatprep.subr.mxu0 %v3895_v21  ;;  %v4137_v47 = vld [vmem:[#allocation7 + $0x60] sm:$0xff] }
 0x1dc   :  { %v3612_v46 = vpop.eup %3611 }
 0x1dd   :  { %438 = vrot.lane.b32.xlu0 %v3612_v46, %s3897_s3  ;;  %v4131_v46 = vld [vmem:[#allocation7 + $0x68] sm:$0xff] }
 0x1de   :  { %v3614_v48 = vpop.eup %3613  ;;  %3229 = vmatpush3.msra.mxu0 %v4131_v46 }
 0x1df   :  { %v433_v49 = vadd.f32 1.0, %v3614_v48  ;;  %3230 = vmatprep.subr.mxu0 %v3895_v21 }
 0x1e0   :  { %3231 = vmatpush3.msra.mxu0 %v4137_v47 }
 0x1e1   :  { %v434_v50 = vmul.f32 0.5, %v433_v49  ;;  %v4143_v49 = vld [vmem:[#allocation7 + $0x58] sm:$0xff]  ;;  %3232 = vmatprep.subr.mxu0 %v3895_v21 }
 0x1e2   :  { %3233 = vmatpush3.msra.mxu0 %v4143_v49 }
 0x1e3   :  { %v436_v53 = vmul.f32 0.0, %v434_v50  ;;  %3234 = vmatprep.subr.mxu0 %v3895_v21 }
 0x24f   :  { %v439_v51 = vpop.permute.xlu0 %438 }
 0x250   :  { %v441_v52 = vmul.f32 %v439_v51, %v434_v50  ;;  %v4155_v51 = vld [vmem:[#allocation7 + $0x48] sm:$0xff] }
 0x252   :  { %443 = vrot.lane.b32.xlu0 %v441_v52, %s3898_s16  ;;  %v4161_v52 = vld [vmem:[#allocation7 + $0x40] sm:$0xff] }
 0x2c4   :  { %v444_v54 = vpop.permute.xlu0 %443 }
 0x2c5   :  { %v4047_v55 = vadd.f32 %v444_v54, %v436_v53 }
 0x2c7   :  { %3615 = vtanh.f32 %v4047_v55  ;;  %v737_v36 = vrot.slane %v4047_v55, 6 }
 0x2d4   :  { %v3616_v62 = vpop.eup %3615 }
 0x2d5   :  { %449 = vrot.lane.b32.xlu1 %v3616_v62, %s3897_s3 }
 0x347   :  { %v450_v1 = vpop.permute.xlu1 %449 }
 0x348   :  { %v452_v2 = vmul.f32 %v450_v1, %v434_v50  ;;  %v4149_v50 = vld [vmem:[#allocation7 + $0x50] sm:$0xff] }
 0x349   :  { %3235 = vmatpush3.msra.mxu0 %v4149_v50 }
 0x34a   :  { %454 = vrot.lane.b32.xlu1 %v452_v2, %s3898_s16  ;;  %3236 = vmatprep.subr.mxu0 %v3895_v21 }
 0x34b   :  { %3237 = vmatpush3.msra.mxu0 %v4155_v51 }
 0x34c   :  { %3238 = vmatprep.subr.mxu0 %v3895_v21 }
 0x34d   :  { %3239 = vmatpush3.msra.mxu0 %v4161_v52 }
 0x34e   :  { %3254 = vmatprep.subr.mxu0 %v3895_v21 }
 0x3bc   :  { %v455_v3 = vpop.permute.xlu1 %454 }
 0x3bd   :  { %v457_v4 = vsel %vm230_vm3, %v455_v3, 0.0 }
 0x3be   :  { %3222 = vmatmul.mubr.msk.f32.vlgmr.msra.gmra.mxu1 %vm458_vm4, %v457_v4 }
 0x3bf   :  { %3244 = vmatpush3.msra.mxu1 %v3993_v27  ;;  %3251 = vmatprep.mubr.msk.f32.mxu1 %vm3896_vm2, %v3895_v21 }
 0x3c0   :  { %3245 = vmatprep.subr.mxu1 %v3895_v21 }
 0x3c1   :  { %3246 = vmatpush3.msra.mxu1 %v4003_v29 }
 0x3c2   :  { %3247 = vmatprep.subr.mxu1 %v3895_v21 }
 0x3c3   :  { %3248 = vmatpush3.msra.mxu1 %v4013_v31 }
 0x3c4   :  { %3249 = vmatprep.subr.mxu1 %v3895_v21 }
 0x3c5   :  { %3250 = vmatpush3.msra.mxu1 %v4023_v33 }
 0x3c6   :  { %3252 = vmatmul.mubr.msk.f32.vlgmr.msra.gmra.mxu1 %vm230_vm3, %v455_v3  ;;  %3273 = vmatprep.subr.mxu1 %v3895_v21 }
 0x3c7   :  { %3289 = vmatprep.mubr.msk.f32.mxu1 %vm3896_vm2, %v3895_v21  ;;  %3274 = vmatpush3.msra.mxu1 %v4124_v44 }
 0x3c8   :  { %3275 = vmatprep.subr.mxu1 %v3895_v21 }
 0x3c9   :  { %3276 = vmatpush3.msra.mxu1 %v4126_v45 }
 0x3ca   :  { %3277 = vmatprep.subr.mxu1 %v3895_v21 }
 0x3cb   :  { %3278 = vmatpush3.msra.mxu1 %v4131_v46 }
 0x3cc   :  { %3279 = vmatprep.subr.mxu1 %v3895_v21 }
 0x3cd   :  { %3280 = vmatpush3.msra.mxu1 %v4137_v47 }
 0x3ce   :  { %3281 = vmatprep.subr.mxu1 %v3895_v21 }
 0x3cf   :  { %3282 = vmatpush3.msra.mxu1 %v4143_v49 }
 0x3d0   :  { %3283 = vmatprep.subr.mxu1 %v3895_v21 }
 0x3d1   :  { %3284 = vmatpush3.msra.mxu1 %v4149_v50 }
 0x3d2   :  { %3285 = vmatprep.subr.mxu1 %v3895_v21 }
 0x3d3   :  { %3286 = vmatpush3.msra.mxu1 %v4155_v51 }
 0x3d4   :  { %3287 = vmatprep.subr.mxu1 %v3895_v21 }
 0x3d5   :  { %3288 = vmatpush3.msra.mxu1 %v4161_v52 }
 0x3d6   :  { %3303 = vmatprep.subr.mxu1 %v3895_v21 }
 0x47e   :  { %v528_v6 = vpop.f32.mrf.mxu1 }
 0x47f   :  { %v529_v7 = vadd.f32 %v4099_v5, %v528_v6 }
 0x480   :  { %v3223_v8 = vpop.f32.mrf.mxu1 }
 0x481   :  { %3617 = vtanh.f32 %v529_v7  ;;  %v532_v16 = vmul.f32 0.5, %v529_v7 }
 0x486   :  { %v722_v9 = vpop.f32.mrf.mxu1 }
 0x487   :  { %v727_v10 = vrot.slane %v722_v9, 6 }
 0x488   :  { %v3253_v11 = vpop.f32.mrf.mxu1 }
 0x489   :  { %v729_v12 = vadd.f32 %v727_v10, %v4039_v42  ;;  %v4230_v11 = vld [vmem:[#allocation8 + $0x2] ss:$0 sm:$0xff] }
 0x48b   :  { %v730_v13 = vadd.f32 %v4041_v43, %v729_v12 }
 0x48d   :  { %3619 = vtanh.f32 %v730_v13  ;;  %v731_v17 = vmul.f32 0.5, %v730_v13 }
 0x48e   :  { %v3618_v14 = vpop.eup %3617  ;;  %3621 = vtanh.f32 %v532_v16 }
 0x48f   :  { %539 = vrot.lane.b32.xlu0 %v3618_v14, %s3897_s3  ;;  %3623 = vtanh.f32 %v731_v17 }
 0x49a   :  { %v3620_v15 = vpop.eup %3619 }
 0x49b   :  { %741 = vrot.lane.b32.xlu1 %v3620_v15, %s3897_s3  ;;  %v3622_v18 = vpop.eup %3621 }
 0x49c   :  { %v534_v19 = vadd.f32 1.0, %v3622_v18  ;;  %v3624_v24 = vpop.eup %3623 }
 0x49d   :  { %v733_v25 = vadd.f32 1.0, %v3624_v24 }
 0x49e   :  { %v4106_v20 = vmul.f32 0.5, %v534_v19 }
 0x49f   :  { %v4110_v26 = vmul.f32 0.5, %v733_v25 }
 0x4a0   :  { %v537_v32 = vmul.f32 0.0, %v4106_v20 }
 0x4a1   :  { %v739_v37 = vmul.f32 %v737_v36, %v4110_v26 }
 0x501   :  { %v540_v22 = vpop.permute.xlu0 %539 }
 0x502   :  { %v542_v23 = vmul.f32 %v540_v22, %v4106_v20 }
 0x504   :  { %544 = vrot.lane.b32.xlu0 %v542_v23, %s3898_s16 }
 0x50d   :  { %v742_v28 = vpop.permute.xlu1 %741 }
 0x50e   :  { %v744_v30 = vmul.f32 %v742_v28, %v4110_v26 }
 0x510   :  { %746 = vrot.lane.b32.xlu1 %v744_v30, %s3898_s16 }
 0x576   :  { %v545_v34 = vpop.permute.xlu0 %544 }
 0x577   :  { %v4115_v35 = vadd.f32 %v545_v34, %v537_v32 }
 0x579   :  { %3625 = vtanh.f32 %v4115_v35 }
 0x582   :  { %v747_v38 = vpop.permute.xlu1 %746 }
 0x583   :  { %v4120_v39 = vadd.f32 %v747_v38, %v739_v37 }
 0x585   :  { %3627 = vtanh.f32 %v4120_v39 }
 0x586   :  { %v3626_v40 = vpop.eup %3625 }
 0x587   :  { %550 = vrot.lane.b32.xlu0 %v3626_v40, %s3897_s3 }
 0x592   :  { %v3628_v48 = vpop.eup %3627 }
 0x593   :  { %752 = vrot.lane.b32.xlu1 %v3628_v48, %s3897_s3 }
 0x5f9   :  { %v551_v53 = vpop.permute.xlu0 %550 }
 0x5fa   :  { %v553_v54 = vmul.f32 %v551_v53, %v4106_v20 }
 0x5fc   :  { %555 = vrot.lane.b32.xlu0 %v553_v54, %s3898_s16  ;;  %v760_v55 = vrot.slane %v553_v54, 6 }
 0x600   :  { %761 = vrot.lane.b32.xlu0 %v760_v55, %s3897_s3 }
 0x605   :  { %v753_v62 = vpop.permute.xlu1 %752 }
 0x606   :  { %v755_v1 = vmul.f32 %v753_v62, %v4110_v26 }
 0x608   :  { %757 = vrot.lane.b32.xlu1 %v755_v1, %s3898_s16  ;;  %v965_v2 = vrot.slane %v755_v1, 2 }
 0x60c   :  { %966 = vrot.lane.b32.xlu1 %v965_v2, %s3898_s16 }
 0x66e   :  { %v556_v3 = vpop.permute.xlu0 %555 }
 0x66f   :  { %v558_v4 = vsel %vm230_vm3, %v556_v3, 0.0 }
 0x670   :  { %3241 = vmatmul.mubr.msk.f32.vlgmr.msra.gmra.mxu0 %vm458_vm4, %v558_v4 }
 0x671   :  { %3255 = vmatpush3.msra.mxu0 %v4050_v56  ;;  %3270 = vmatprep.mubr.msk.f32.mxu0 %vm3896_vm2, %v3895_v21 }
 0x672   :  { %3256 = vmatprep.subr.mxu0 %v3895_v21  ;;  %v762_v6 = vpop.permute.xlu0 %761 }
 0x673   :  { %3257 = vmatpush3.msra.mxu0 %v4052_v57 }
 0x674   :  { %3258 = vmatprep.subr.mxu0 %v3895_v21 }
 0x675   :  { %3259 = vmatpush3.msra.mxu0 %v4056_v58 }
 0x676   :  { %3260 = vmatprep.subr.mxu0 %v3895_v21 }
 0x677   :  { %3261 = vmatpush3.msra.mxu0 %v4060_v59 }
 0x678   :  { %3262 = vmatprep.subr.mxu0 %v3895_v21 }
 0x679   :  { %3263 = vmatpush3.msra.mxu0 %v4064_v60 }
 0x67a   :  { %3264 = vmatprep.subr.mxu0 %v3895_v21  ;;  %v758_v7 = vpop.permute.xlu1 %757 }
 0x67b   :  { %v764_v8 = vsel %vm230_vm3, %v758_v7, %v762_v6  ;;  %3265 = vmatpush3.msra.mxu0 %v4068_v61 }
 0x67c   :  { %3266 = vmatprep.subr.mxu0 %v3895_v21  ;;  %v766_v9 = vrot.slane %v764_v8, 2 }
 0x67d   :  { %3267 = vmatpush3.msra.mxu0 %v4072_v63 }
 0x67e   :  { %3268 = vmatprep.subr.mxu0 %v3895_v21  ;;  %v967_v10 = vpop.permute.xlu1 %966 }
 0x67f   :  { %3269 = vmatpush3.msra.mxu0 %v4077_v0 }
 0x680   :  { %3271 = vmatmul.mubr.msk.f32.vlgmr.msra.gmra.mxu0 %vm458_vm4, %v766_v9  ;;  %3292 = vmatprep.subr.mxu0 %v3895_v21 }
 0x681   :  { %3293 = vmatpush3.msra.mxu0 %v3993_v27  ;;  %3300 = vmatprep.mubr.msk.f32.mxu0 %vm3896_vm2, %v3895_v21 }
 0x682   :  { %3294 = vmatprep.subr.mxu0 %v3895_v21 }
 0x683   :  { %3295 = vmatpush3.msra.mxu0 %v4003_v29 }
 0x684   :  { %3296 = vmatprep.subr.mxu0 %v3895_v21 }
 0x685   :  { %3297 = vmatpush3.msra.mxu0 %v4013_v31 }
 0x686   :  { %3298 = vmatprep.subr.mxu0 %v3895_v21 }
 0x687   :  { %3299 = vmatpush3.msra.mxu0 %v4023_v33 }
 0x688   :  { %3301 = vmatmul.mubr.msk.f32.vlgmr.msra.gmra.mxu0 %vm230_vm3, %v967_v10  ;;  %3322 = vmatprep.subr.mxu0 %v3895_v21 }
 0x689   :  { %3323 = vmatpush3.msra.mxu0 %v4124_v44  ;;  %3338 = vmatprep.mubr.msk.f32.mxu0 %vm3896_vm2, %v3895_v21 }
 0x68a   :  { %3324 = vmatprep.subr.mxu0 %v3895_v21 }
 0x68b   :  { %3325 = vmatpush3.msra.mxu0 %v4126_v45 }
 0x68c   :  { %3326 = vmatprep.subr.mxu0 %v3895_v21 }
 0x68d   :  { %3327 = vmatpush3.msra.mxu0 %v4131_v46 }
 0x68e   :  { %3328 = vmatprep.subr.mxu0 %v3895_v21 }
 0x68f   :  { %3329 = vmatpush3.msra.mxu0 %v4137_v47 }
 0x690   :  { %3330 = vmatprep.subr.mxu0 %v3895_v21 }
 0x691   :  { %3331 = vmatpush3.msra.mxu0 %v4143_v49 }
 0x692   :  { %3332 = vmatprep.subr.mxu0 %v3895_v21 }
 0x693   :  { %3333 = vmatpush3.msra.mxu0 %v4149_v50 }
 0x694   :  { %3334 = vmatprep.subr.mxu0 %v3895_v21 }
 0x695   :  { %3335 = vmatpush3.msra.mxu0 %v4155_v51 }
 0x696   :  { %3336 = vmatprep.subr.mxu0 %v3895_v21 }
 0x697   :  { %3337 = vmatpush3.msra.mxu0 %v4161_v52 }
 0x698   :  { %3352 = vmatprep.subr.mxu0 %v3895_v21 }
 0x730   :  { %v628_v12 = vpop.f32.mrf.mxu0 }
 0x731   :  { %v629_v13 = vadd.f32 %v4230_v11, %v628_v12 }
 0x732   :  { %v3242_v14 = vpop.f32.mrf.mxu0 }
 0x733   :  { %3629 = vtanh.f32 %v629_v13  ;;  %v632_v28 = vmul.f32 0.5, %v629_v13 }
 0x740   :  { %v3630_v15 = vpop.eup %3629  ;;  %v835_v16 = vpop.f32.mrf.mxu0 }
 0x741   :  { %v836_v17 = vadd.f32 %v4099_v5, %v835_v16  ;;  %639 = vrot.lane.b32.xlu0 %v3630_v15, %s3897_s3  ;;  %v1051_v15 = vrot.slane %v4120_v39, 6 }
 0x742   :  { %v3272_v18 = vpop.f32.mrf.mxu0 }
 0x743   :  { %3631 = vtanh.f32 %v836_v17  ;;  %v839_v30 = vmul.f32 0.5, %v836_v17 }
 0x748   :  { %v1036_v19 = vpop.f32.mrf.mxu0 }
 0x749   :  { %v1041_v20 = vrot.slane %v1036_v19, 4 }
 0x74a   :  { %v3302_v22 = vpop.f32.mrf.mxu0 }
 0x74b   :  { %v1043_v23 = vadd.f32 %v1041_v20, %v4039_v42 }
 0x74d   :  { %v1044_v24 = vadd.f32 %v4041_v43, %v1043_v23 }
 0x74f   :  { %3633 = vtanh.f32 %v1044_v24  ;;  %v1045_v40 = vmul.f32 0.5, %v1044_v24 }
 0x750   :  { %v3632_v25 = vpop.eup %3631  ;;  %3635 = vtanh.f32 %v632_v28 }
 0x751   :  { %846 = vrot.lane.b32.xlu1 %v3632_v25, %s3897_s3  ;;  %3637 = vtanh.f32 %v839_v30 }
 0x752   :  { %3639 = vtanh.f32 %v1045_v40 }
 0x75c   :  { %v3634_v26 = vpop.eup %3633 }
 0x75d   :  { %1055 = vrot.lane.b32.xlu0 %v3634_v26, %s3897_s3  ;;  %v3636_v32 = vpop.eup %3635 }
 0x75e   :  { %v634_v34 = vadd.f32 1.0, %v3636_v32  ;;  %v3638_v48 = vpop.eup %3637 }
 0x75f   :  { %v841_v53 = vadd.f32 1.0, %v3638_v48  ;;  %v3640_v1 = vpop.eup %3639 }
 0x760   :  { %v635_v36 = vmul.f32 0.5, %v634_v34  ;;  %v1047_v2 = vadd.f32 1.0, %v3640_v1 }
 0x761   :  { %v842_v54 = vmul.f32 0.5, %v841_v53 }
 0x762   :  { %v1048_v3 = vmul.f32 0.5, %v1047_v2  ;;  %v637_v7 = vmul.f32 0.0, %v635_v36 }
 0x763   :  { %v844_v10 = vmul.f32 %v842_v54, %v4115_v35 }
 0x764   :  { %v1053_v16 = vmul.f32 %v1051_v15, %v1048_v3 }
 0x7b3   :  { %v640_v37 = vpop.permute.xlu0 %639 }
 0x7b4   :  { %v642_v38 = vmul.f32 %v640_v37, %v635_v36 }
 0x7b6   :  { %644 = vrot.lane.b32.xlu1 %v642_v38, %s3898_s16 }
 0x7c3   :  { %v847_v55 = vpop.permute.xlu1 %846 }
 0x7c4   :  { %v849_v62 = vmul.f32 %v847_v55, %v842_v54 }
 0x7c6   :  { %851 = vrot.lane.b32.xlu0 %v849_v62, %s3898_s16 }
 0x7cf   :  { %v1056_v4 = vpop.permute.xlu0 %1055 }
 0x7d0   :  { %v1058_v6 = vmul.f32 %v1056_v4, %v1048_v3 }
 0x7d2   :  { %1060 = vrot.lane.b32.xlu1 %v1058_v6, %s3898_s16 }
 0x828   :  { %v645_v8 = vpop.permute.xlu1 %644 }
 0x829   :  { %v4242_v9 = vadd.f32 %v645_v8, %v637_v7 }
 0x82b   :  { %3641 = vtanh.f32 %v4242_v9 }
 0x838   :  { %v3642_v12 = vpop.eup %3641  ;;  %v852_v13 = vpop.permute.xlu0 %851 }
 0x839   :  { %v4246_v14 = vadd.f32 %v852_v13, %v844_v10  ;;  %650 = vrot.lane.b32.xlu0 %v3642_v12, %s3897_s3 }
 0x83b   :  { %3643 = vtanh.f32 %v4246_v14 }
 0x844   :  { %v1061_v17 = vpop.permute.xlu1 %1060 }
 0x845   :  { %v4251_v18 = vadd.f32 %v1061_v17, %v1053_v16 }
 0x847   :  { %3645 = vtanh.f32 %v4251_v18 }
 0x848   :  { %v3644_v19 = vpop.eup %3643 }
 0x849   :  { %857 = vrot.lane.b32.xlu1 %v3644_v19, %s3897_s3 }
 0x854   :  { %v3646_v35 = vpop.eup %3645 }
 0x855   :  { %1066 = vrot.lane.b32.xlu0 %v3646_v35, %s3897_s3 }
 0x8ab   :  { %v651_v20 = vpop.permute.xlu0 %650 }
 0x8ac   :  { %v653_v22 = vmul.f32 %v651_v20, %v635_v36 }
 0x8ae   :  { %866 = vrot.lane.b32.xlu0 %v653_v22, %s3897_s3 }
 0x8bb   :  { %v858_v23 = vpop.permute.xlu1 %857 }
 0x8bc   :  { %v860_v24 = vmul.f32 %v858_v23, %v842_v54 }
 0x8be   :  { %v1074_v25 = vrot.slane %v860_v24, 4  ;;  %862 = vrot.lane.b32.xlu1 %v860_v24, %s3898_s16 }
 0x8c0   :  { %1075 = vrot.lane.b32.xlu0 %v1074_v25, %s3897_s3 }
 0x8c7   :  { %v1067_v39 = vpop.permute.xlu0 %1066 }
 0x8c8   :  { %v1069_v26 = vmul.f32 %v1067_v39, %v1048_v3 }
 0x8ca   :  { %1071 = vrot.lane.b32.xlu1 %v1069_v26, %s3898_s16  ;;  %v1279_v28 = vrot.slane %v1069_v26, 4 }
 0x8ce   :  { %1280 = vrot.lane.b32.xlu1 %v1279_v28, %s3898_s16 }
 0x920   :  { %v867_v30 = vpop.permute.xlu0 %866 }
 0x930   :  { %v863_v32 = vpop.permute.xlu1 %862 }
 0x931   :  { %v869_v34 = vsel %vm230_vm3, %v863_v32, %v867_v30 }
 0x932   :  { %3290 = vmatmul.mubr.msk.f32.vlgmr.msra.gmra.mxu1 %vm458_vm4, %v869_v34  ;;  %v1076_v36 = vpop.permute.xlu0 %1075 }
 0x933   :  { %3304 = vmatpush3.msra.mxu1 %v4050_v56  ;;  %3319 = vmatprep.mubr.msk.f32.mxu1 %vm3896_vm2, %v3895_v21 }
 0x934   :  { %3305 = vmatprep.subr.mxu1 %v3895_v21 }
 0x935   :  { %3306 = vmatpush3.msra.mxu1 %v4052_v57 }
 0x936   :  { %3307 = vmatprep.subr.mxu1 %v3895_v21 }
 0x937   :  { %3308 = vmatpush3.msra.mxu1 %v4056_v58 }
 0x938   :  { %3309 = vmatprep.subr.mxu1 %v3895_v21 }
 0x939   :  { %3310 = vmatpush3.msra.mxu1 %v4060_v59 }
 0x93a   :  { %3311 = vmatprep.subr.mxu1 %v3895_v21 }
 0x93b   :  { %3312 = vmatpush3.msra.mxu1 %v4064_v60 }
 0x93c   :  { %3313 = vmatprep.subr.mxu1 %v3895_v21  ;;  %v1072_v37 = vpop.permute.xlu1 %1071 }
 0x93d   :  { %3314 = vmatpush3.msra.mxu1 %v4068_v61  ;;  %v1078_v38 = vsel %vm230_vm3, %v1072_v37, %v1076_v36 }
 0x93e   :  { %v1080_v40 = vrot.slane %v1078_v38, 4  ;;  %3315 = vmatprep.subr.mxu1 %v3895_v21 }
 0x93f   :  { %3316 = vmatpush3.msra.mxu1 %v4072_v63 }
 0x940   :  { %3317 = vmatprep.subr.mxu1 %v3895_v21  ;;  %v1281_v48 = vpop.permute.xlu1 %1280 }
 0x941   :  { %3318 = vmatpush3.msra.mxu1 %v4077_v0 }
 0x942   :  { %3320 = vmatmul.mubr.msk.f32.vlgmr.msra.gmra.mxu1 %vm458_vm4, %v1080_v40  ;;  %3341 = vmatprep.subr.mxu1 %v3895_v21 }
 0x943   :  { %3342 = vmatpush3.msra.mxu1 %v3993_v27  ;;  %3349 = vmatprep.mubr.msk.f32.mxu1 %vm3896_vm2, %v3895_v21 }
 0x944   :  { %3343 = vmatprep.subr.mxu1 %v3895_v21 }
 0x945   :  { %3344 = vmatpush3.msra.mxu1 %v4003_v29 }
 0x946   :  { %3345 = vmatprep.subr.mxu1 %v3895_v21 }
 0x947   :  { %3346 = vmatpush3.msra.mxu1 %v4013_v31 }
 0x948   :  { %3347 = vmatprep.subr.mxu1 %v3895_v21 }
 0x949   :  { %3348 = vmatpush3.msra.mxu1 %v4023_v33 }
 0x94a   :  { %3350 = vmatmul.mubr.msk.f32.vlgmr.msra.gmra.mxu1 %vm230_vm3, %v1281_v48  ;;  %3371 = vmatprep.subr.mxu1 %v3895_v21 }
 0x94b   :  { %3372 = vmatpush3.msra.mxu1 %v4124_v44  ;;  %3387 = vmatprep.mubr.msk.f32.mxu1 %vm3896_vm2, %v3895_v21 }
 0x94c   :  { %3373 = vmatprep.subr.mxu1 %v3895_v21 }
 0x94d   :  { %3374 = vmatpush3.msra.mxu1 %v4126_v45 }
 0x94e   :  { %3375 = vmatprep.subr.mxu1 %v3895_v21 }
 0x94f   :  { %3376 = vmatpush3.msra.mxu1 %v4131_v46 }
 0x950   :  { %3377 = vmatprep.subr.mxu1 %v3895_v21 }
 0x951   :  { %3378 = vmatpush3.msra.mxu1 %v4137_v47 }
 0x952   :  { %3379 = vmatprep.subr.mxu1 %v3895_v21 }
 0x953   :  { %3380 = vmatpush3.msra.mxu1 %v4143_v49 }
 0x954   :  { %3381 = vmatprep.subr.mxu1 %v3895_v21 }
 0x955   :  { %3382 = vmatpush3.msra.mxu1 %v4149_v50 }
 0x956   :  { %3383 = vmatprep.subr.mxu1 %v3895_v21 }
 0x957   :  { %3384 = vmatpush3.msra.mxu1 %v4155_v51 }
 0x958   :  { %3385 = vmatprep.subr.mxu1 %v3895_v21 }
 0x959   :  { %3386 = vmatpush3.msra.mxu1 %v4161_v52 }
 0x95a   :  { %3401 = vmatprep.subr.mxu1 %v3895_v21 }
 0x9f2   :  { %v939_v53 = vpop.f32.mrf.mxu1 }
 0x9f3   :  { %v940_v54 = vadd.f32 %v4230_v11, %v939_v53 }
 0x9f4   :  { %v3291_v55 = vpop.f32.mrf.mxu1 }
 0x9f5   :  { %3647 = vtanh.f32 %v940_v54  ;;  %v943_v15 = vmul.f32 0.5, %v940_v54 }
 0xa02   :  { %v3648_v62 = vpop.eup %3647  ;;  %v1149_v1 = vpop.f32.mrf.mxu1 }
 0xa03   :  { %v1150_v2 = vadd.f32 %v4099_v5, %v1149_v1  ;;  %950 = vrot.lane.b32.xlu0 %v3648_v62, %s3897_s3  ;;  %v1365_v62 = vrot.slane %v4251_v18, 6 }
 0xa04   :  { %v3321_v3 = vpop.f32.mrf.mxu1 }
 0xa05   :  { %3649 = vtanh.f32 %v1150_v2  ;;  %v1153_v16 = vmul.f32 0.5, %v1150_v2 }
 0xa0a   :  { %v1350_v4 = vpop.f32.mrf.mxu1 }
 0xa0b   :  { %v1355_v6 = vrot.slane %v1350_v4, 2 }
 0xa0c   :  { %v3351_v7 = vpop.f32.mrf.mxu1 }
 0xa0d   :  { %v1357_v8 = vadd.f32 %v1355_v6, %v4039_v42 }
 0xa0f   :  { %v1358_v10 = vadd.f32 %v4041_v43, %v1357_v8 }
 0xa11   :  { %3651 = vtanh.f32 %v1358_v10  ;;  %v1359_v23 = vmul.f32 0.5, %v1358_v10 }
 0xa12   :  { %v3650_v12 = vpop.eup %3649  ;;  %3653 = vtanh.f32 %v943_v15 }
 0xa13   :  { %1160 = vrot.lane.b32.xlu1 %v3650_v12, %s3897_s3  ;;  %3655 = vtanh.f32 %v1153_v16 }
 0xa14   :  { %3657 = vtanh.f32 %v1359_v23 }
 0xa1e   :  { %v3652_v13 = vpop.eup %3651 }
 0xa1f   :  { %1369 = vrot.lane.b32.xlu0 %v3652_v13, %s3897_s3  ;;  %v3654_v17 = vpop.eup %3653 }
 0xa20   :  { %v945_v19 = vadd.f32 1.0, %v3654_v17  ;;  %v3656_v42 = vpop.eup %3655 }
 0xa21   :  { %v1155_v24 = vadd.f32 1.0, %v3656_v42  ;;  %v3658_v28 = vpop.eup %3657 }
 0xa22   :  { %v946_v35 = vmul.f32 0.5, %v945_v19  ;;  %v1361_v30 = vadd.f32 1.0, %v3658_v28 }
 0xa23   :  { %v1156_v25 = vmul.f32 0.5, %v1155_v24 }
 0xa24   :  { %v1362_v32 = vmul.f32 0.5, %v1361_v30  ;;  %v948_v37 = vmul.f32 %v946_v35, %v4242_v9 }
 0xa25   :  { %v1158_v48 = vmul.f32 %v1156_v25, %v4246_v14 }
 0xa26   :  { %v1367_v1 = vmul.f32 %v1365_v62, %v1362_v32 }
 0xa75   :  { %v951_v20 = vpop.permute.xlu0 %950 }
 0xa76   :  { %v953_v22 = vmul.f32 %v951_v20, %v946_v35 }
 0xa78   :  { %955 = vrot.lane.b32.xlu1 %v953_v22, %s3898_s16 }
 0xa85   :  { %v1161_v39 = vpop.permute.xlu1 %1160 }
 0xa86   :  { %v1163_v26 = vmul.f32 %v1161_v39, %v1156_v25 }
 0xa88   :  { %1165 = vrot.lane.b32.xlu0 %v1163_v26, %s3898_s16 }
 0xa91   :  { %v1370_v34 = vpop.permute.xlu0 %1369 }
 0xa92   :  { %v1372_v36 = vmul.f32 %v1370_v34, %v1362_v32 }
 0xa94   :  { %1374 = vrot.lane.b32.xlu1 %v1372_v36, %s3898_s16 }
 0xaea   :  { %v956_v38 = vpop.permute.xlu1 %955 }
 0xaeb   :  { %v4323_v40 = vadd.f32 %v956_v38, %v948_v37 }
 0xaed   :  { %3659 = vtanh.f32 %v4323_v40 }
 0xafa   :  { %v3660_v53 = vpop.eup %3659  ;;  %v1166_v54 = vpop.permute.xlu0 %1165 }
 0xafb   :  { %v4327_v55 = vadd.f32 %v1166_v54, %v1158_v48  ;;  %961 = vrot.lane.b32.xlu0 %v3660_v53, %s3897_s3 }
 0xafd   :  { %3661 = vtanh.f32 %v4327_v55 }
 0xb06   :  { %v1375_v2 = vpop.permute.xlu1 %1374 }
 0xb07   :  { %v4332_v9 = vadd.f32 %v1375_v2, %v1367_v1 }
 0xb09   :  { %3663 = vtanh.f32 %v4332_v9 }
 0xb0a   :  { %v3662_v3 = vpop.eup %3661 }
 0xb0b   :  { %1171 = vrot.lane.b32.xlu1 %v3662_v3, %s3897_s3 }
 0xb16   :  { %v3664_v14 = vpop.eup %3663 }
 0xb17   :  { %1380 = vrot.lane.b32.xlu0 %v3664_v14, %s3897_s3 }
 0xb6d   :  { %v962_v4 = vpop.permute.xlu0 %961 }
 0xb6e   :  { %v964_v6 = vmul.f32 %v962_v4, %v946_v35 }
 0xb70   :  { %1180 = vrot.lane.b32.xlu0 %v964_v6, %s3897_s3 }
 0xb7d   :  { %v1172_v7 = vpop.permute.xlu1 %1171 }
 0xb7e   :  { %v1174_v8 = vmul.f32 %v1172_v7, %v1156_v25 }
 0xb80   :  { %v1388_v10 = vrot.slane %v1174_v8, 2  ;;  %1176 = vrot.lane.b32.xlu1 %v1174_v8, %s3898_s16 }
 0xb82   :  { %1389 = vrot.lane.b32.xlu0 %v1388_v10, %s3897_s3  ;;  %v1676_v10 = vrot.slane %v4332_v9, 6 }
 0xb89   :  { %v1381_v18 = vpop.permute.xlu0 %1380 }
 0xb8a   :  { %v1383_v12 = vmul.f32 %v1381_v18, %v1362_v32 }
 0xb8c   :  { %1385 = vrot.lane.b32.xlu1 %v1383_v12, %s3898_s16  ;;  %v1593_v13 = vrot.slane %v1383_v12, 6 }
 0xb90   :  { %1594 = vrot.lane.b32.xlu1 %v1593_v13, %s3898_s16 }
 0xbe2   :  { %v1181_v15 = vpop.permute.xlu0 %1180 }
 0xbf2   :  { %v1177_v16 = vpop.permute.xlu1 %1176 }
 0xbf3   :  { %v1183_v17 = vsel %vm230_vm3, %v1177_v16, %v1181_v15 }
 0xbf4   :  { %3339 = vmatmul.mubr.msk.f32.vlgmr.msra.gmra.mxu0 %vm458_vm4, %v1183_v17 }
 0xbf5   :  { %3353 = vmatpush3.msra.mxu0 %v4050_v56  ;;  %3368 = vmatprep.mubr.msk.f32.mxu0 %vm3896_vm2, %v3895_v21  ;;  %v1390_v56 = vpop.permute.xlu0 %1389 }
 0xbf6   :  { %3354 = vmatprep.subr.mxu0 %v3895_v21 }
 0xbf7   :  { %3355 = vmatpush3.msra.mxu0 %v4052_v57 }
 0xbf8   :  { %3356 = vmatprep.subr.mxu0 %v3895_v21 }
 0xbf9   :  { %3357 = vmatpush3.msra.mxu0 %v4056_v58 }
 0xbfa   :  { %3358 = vmatprep.subr.mxu0 %v3895_v21 }
 0xbfb   :  { %3359 = vmatpush3.msra.mxu0 %v4060_v59 }
 0xbfc   :  { %3360 = vmatprep.subr.mxu0 %v3895_v21 }
 0xbfd   :  { %3361 = vmatpush3.msra.mxu0 %v4064_v60 }
 0xbfe   :  { %3362 = vmatprep.subr.mxu0 %v3895_v21  ;;  %v1386_v19 = vpop.permute.xlu1 %1385 }
 0xbff   :  { %v1392_v35 = vsel %vm230_vm3, %v1386_v19, %v1390_v56  ;;  %3363 = vmatpush3.msra.mxu0 %v4068_v61 }
 0xc00   :  { %v1394_v57 = vrot.slane %v1392_v35, 6  ;;  %3364 = vmatprep.subr.mxu0 %v3895_v21 }
 0xc01   :  { %3365 = vmatpush3.msra.mxu0 %v4072_v63 }
 0xc02   :  { %3366 = vmatprep.subr.mxu0 %v3895_v21  ;;  %v1595_v58 = vpop.permute.xlu1 %1594 }
 0xc03   :  { %3367 = vmatpush3.msra.mxu0 %v4077_v0 }
 0xc04   :  { %3369 = vmatmul.mubr.msk.f32.vlgmr.msra.gmra.mxu0 %vm458_vm4, %v1394_v57  ;;  %3390 = vmatprep.subr.mxu0 %v3895_v21 }
 0xc05   :  { %3391 = vmatpush3.msra.mxu0 %v3993_v27  ;;  %3398 = vmatprep.mubr.msk.f32.mxu0 %vm3896_vm2, %v3895_v21 }
 0xc06   :  { %3392 = vmatprep.subr.mxu0 %v3895_v21 }
 0xc07   :  { %3393 = vmatpush3.msra.mxu0 %v4003_v29 }
 0xc08   :  { %3394 = vmatprep.subr.mxu0 %v3895_v21 }
 0xc09   :  { %3395 = vmatpush3.msra.mxu0 %v4013_v31 }
 0xc0a   :  { %3396 = vmatprep.subr.mxu0 %v3895_v21 }
 0xc0b   :  { %3397 = vmatpush3.msra.mxu0 %v4023_v33 }
 0xc0c   :  { %3399 = vmatmul.mubr.msk.f32.vlgmr.msra.gmra.mxu0 %vm230_vm3, %v1595_v58  ;;  %3420 = vmatprep.subr.mxu0 %v3895_v21 }
 0xc0d   :  { %3421 = vmatpush3.msra.mxu0 %v4124_v44  ;;  %3436 = vmatprep.mubr.msk.f32.mxu0 %vm3896_vm2, %v3895_v21 }
 0xc0e   :  { %3422 = vmatprep.subr.mxu0 %v3895_v21 }
 0xc0f   :  { %3423 = vmatpush3.msra.mxu0 %v4126_v45 }
 0xc10   :  { %3424 = vmatprep.subr.mxu0 %v3895_v21 }
 0xc11   :  { %3425 = vmatpush3.msra.mxu0 %v4131_v46 }
 0xc12   :  { %3426 = vmatprep.subr.mxu0 %v3895_v21 }
 0xc13   :  { %3427 = vmatpush3.msra.mxu0 %v4137_v47 }
 0xc14   :  { %3428 = vmatprep.subr.mxu0 %v3895_v21 }
 0xc15   :  { %3429 = vmatpush3.msra.mxu0 %v4143_v49 }
 0xc16   :  { %3430 = vmatprep.subr.mxu0 %v3895_v21 }
 0xc17   :  { %3431 = vmatpush3.msra.mxu0 %v4149_v50 }
 0xc18   :  { %3432 = vmatprep.subr.mxu0 %v3895_v21 }
 0xc19   :  { %3433 = vmatpush3.msra.mxu0 %v4155_v51 }
 0xc1a   :  { %3434 = vmatprep.subr.mxu0 %v3895_v21 }
 0xc1b   :  { %3435 = vmatpush3.msra.mxu0 %v4161_v52 }
 0xc1c   :  { %3450 = vmatprep.subr.mxu0 %v3895_v21 }
 0xcb4   :  { %v1253_v27 = vpop.f32.mrf.mxu0 }
 0xcb5   :  { %v1254_v29 = vadd.f32 %v4230_v11, %v1253_v27  ;;  %v4424_v27 = vld [vmem:[#allocation7 + $0x38] sm:$0xff] }
 0xcb6   :  { %v3340_v31 = vpop.f32.mrf.mxu0 }
 0xcb7   :  { %3665 = vtanh.f32 %v1254_v29  ;;  %v1257_v24 = vmul.f32 0.5, %v1254_v29  ;;  %v4430_v29 = vld [vmem:[#allocation7 + $0x30] sm:$0xff]  ;;  %v4434_v31 = vld [vmem:[#allocation7 + $0x28] sm:$0xff] }
 0xcc4   :  { %v3666_v33 = vpop.eup %3665  ;;  %v1463_v59 = vpop.f32.mrf.mxu0 }
 0xcc5   :  { %v1464_v60 = vadd.f32 %v4099_v5, %v1463_v59  ;;  %1264 = vrot.lane.b32.xlu0 %v3666_v33, %s3897_s3  ;;  %v4438_v33 = vld [vmem:[#allocation7 + $0x20] sm:$0xff]  ;;  %v4442_v59 = vld [vmem:[#allocation7 + $0x18] sm:$0xff] }
 0xcc6   :  { %v3370_v61 = vpop.f32.mrf.mxu0 }
 0xcc7   :  { %3667 = vtanh.f32 %v1464_v60  ;;  %v1467_v5 = vmul.f32 0.5, %v1464_v60  ;;  %v4446_v60 = vld [vmem:[#allocation7 + $0x10] sm:$0xff] }
 0xccc   :  { %v1664_v63 = vpop.f32.mrf.mxu0 }
 0xccd   :  { %v1668_v0 = vadd.f32 %v4037_v41, %v1664_v63  ;;  %v4450_v63 = vld [vmem:[#allocation7 + $0x8] sm:$0xff] }
 0xcce   :  { %v3400_v20 = vpop.f32.mrf.mxu0 }
 0xccf   :  { %v1669_v22 = vadd.f32 %v4041_v43, %v1668_v0 }
 0xcd1   :  { %3669 = vtanh.f32 %v1669_v22  ;;  %v1670_v30 = vmul.f32 0.5, %v1669_v22  ;;  %v4455_v22 = vld [vmem:[#allocation7] sm:$0xff] }
 0xcd2   :  { %3671 = vtanh.f32 %v1257_v24  ;;  %v4479_v24 = vld [vmem:[%s4787_s4 + $0x8] sm:$0xff] }
 0xcd3   :  { %3673 = vtanh.f32 %v1467_v5  ;;  %v4486_v5 = vld [vmem:[%s4787_s4] sm:$0xff] }
 0xcd4   :  { %v3668_v23 = vpop.eup %3667  ;;  %3675 = vtanh.f32 %v1670_v30  ;;  %v4515_v30 = vld [vmem:[#allocation8] ss:$0 sm:$0xff] }
 0xcd5   :  { %1474 = vrot.lane.b32.xlu1 %v3668_v23, %s3897_s3  ;;  %v4463_v23 = vld [vmem:[%s4787_s4 + $0x18] sm:$0xff] }
 0xcde   :  { %v3670_v42 = vpop.eup %3669 }
 0xcdf   :  { %1680 = vrot.lane.b32.xlu0 %v3670_v42, %s3897_s3  ;;  %v3672_v25 = vpop.eup %3671  ;;  %v4472_v42 = vld [vmem:[%s4787_s4 + $0x10] sm:$0xff] }
 0xce0   :  { %v1259_v39 = vadd.f32 1.0, %v3672_v25  ;;  %v3674_v43 = vpop.eup %3673  ;;  %v4510_v25 = vld [vmem:[#allocation8 + $0x1] ss:$0 sm:$0xff] }
 0xce1   :  { %v1469_v34 = vadd.f32 1.0, %v3674_v43  ;;  %v3676_v48 = vpop.eup %3675 }
 0xce2   :  { %v1260_v26 = vmul.f32 0.5, %v1259_v39  ;;  %v1672_v53 = vadd.f32 1.0, %v3676_v48 }
 0xce3   :  { %v1470_v36 = vmul.f32 0.5, %v1469_v34 }
 0xce4   :  { %v1673_v54 = vmul.f32 0.5, %v1672_v53  ;;  %v1262_v2 = vmul.f32 %v1260_v26, %v4323_v40 }
 0xce5   :  { %v1472_v4 = vmul.f32 %v1470_v36, %v4327_v55 }
 0xce6   :  { %v1678_v18 = vmul.f32 %v1676_v10, %v1673_v54 }
 0xd37   :  { %v1265_v28 = vpop.permute.xlu0 %1264 }
 0xd38   :  { %v1267_v32 = vmul.f32 %v1265_v28, %v1260_v26 }
 0xd3a   :  { %1269 = vrot.lane.b32.xlu1 %v1267_v32, %s3898_s16 }
 0xd47   :  { %v1475_v37 = vpop.permute.xlu1 %1474 }
 0xd48   :  { %v1477_v38 = vmul.f32 %v1475_v37, %v1470_v36 }
 0xd4a   :  { %1479 = vrot.lane.b32.xlu0 %v1477_v38, %s3898_s16 }
 0xd51   :  { %v1681_v62 = vpop.permute.xlu0 %1680 }
 0xd52   :  { %v1683_v1 = vmul.f32 %v1681_v62, %v1673_v54 }
 0xd54   :  { %1685 = vrot.lane.b32.xlu1 %v1683_v1, %s3898_s16 }
 0xdac   :  { %v1270_v3 = vpop.permute.xlu1 %1269 }
 0xdad   :  { %v4404_v14 = vadd.f32 %v1270_v3, %v1262_v2 }
 0xdaf   :  { %3677 = vtanh.f32 %v4404_v14 }
 0xdbc   :  { %v3678_v6 = vpop.eup %3677  ;;  %v1480_v7 = vpop.permute.xlu0 %1479 }
 0xdbd   :  { %v4408_v8 = vadd.f32 %v1480_v7, %v1472_v4  ;;  %1275 = vrot.lane.b32.xlu0 %v3678_v6, %s3897_s3 }
 0xdbf   :  { %3679 = vtanh.f32 %v4408_v8 }
 0xdc6   :  { %v1686_v12 = vpop.permute.xlu1 %1685 }
 0xdc7   :  { %v4413_v40 = vadd.f32 %v1686_v12, %v1678_v18 }
 0xdc9   :  { %3681 = vtanh.f32 %v4413_v40 }
 0xdcc   :  { %v3680_v13 = vpop.eup %3679 }
 0xdcd   :  { %1485 = vrot.lane.b32.xlu1 %v3680_v13, %s3897_s3 }
 0xdd6   :  { %v3682_v55 = vpop.eup %3681 }
 0xdd7   :  { %1691 = vrot.lane.b32.xlu0 %v3682_v55, %s3897_s3 }
 0xe2f   :  { %v1276_v15 = vpop.permute.xlu0 %1275 }
 0xe30   :  { %v1278_v16 = vmul.f32 %v1276_v15, %v1260_v26 }
 0xe32   :  { %1494 = vrot.lane.b32.xlu0 %v1278_v16, %s3897_s3 }
 0xe3f   :  { %v1486_v17 = vpop.permute.xlu1 %1485 }
 0xe40   :  { %v1488_v56 = vmul.f32 %v1486_v17, %v1470_v36 }
 0xe42   :  { %1490 = vrot.lane.b32.xlu1 %v1488_v56, %s3898_s16  ;;  %1699 = vrot.lane.b32.xlu0 %v1488_v56, %s3897_s3 }
 0xe49   :  { %v1692_v9 = vpop.permute.xlu0 %1691 }
 0xe4a   :  { %v1694_v19 = vmul.f32 %v1692_v9, %v1673_v54 }
 0xe4c   :  { %1696 = vrot.lane.b32.xlu1 %v1694_v19, %s3898_s16 }
 0xea4   :  { %v1495_v35 = vpop.permute.xlu0 %1494 }
 0xeb4   :  { %v1491_v57 = vpop.permute.xlu1 %1490  ;;  %v1700_v0 = vpop.permute.xlu0 %1699 }
 0xeb5   :  { %v1497_v58 = vsel %vm230_vm3, %v1491_v57, %v1495_v35  ;;  %v1985_v35 = vrot.slane %v4413_v40, 6 }
 0xeb6   :  { %3388 = vmatmul.mubr.msk.f32.vlgmr.msra.gmra.mxu1 %vm458_vm4, %v1497_v58 }
 0xeb7   :  { %3402 = vmatpush3.msra.mxu1 %v4424_v27  ;;  %3417 = vmatprep.mubr.msk.f32.mxu1 %vm3896_vm2, %v3895_v21 }
 0xeb8   :  { %3403 = vmatprep.subr.mxu1 %v3895_v21 }
 0xeb9   :  { %3404 = vmatpush3.msra.mxu1 %v4430_v29 }
 0xeba   :  { %3405 = vmatprep.subr.mxu1 %v3895_v21 }
 0xebb   :  { %3406 = vmatpush3.msra.mxu1 %v4434_v31 }
 0xebc   :  { %3407 = vmatprep.subr.mxu1 %v3895_v21 }
 0xebd   :  { %3408 = vmatpush3.msra.mxu1 %v4438_v33 }
 0xebe   :  { %3409 = vmatprep.subr.mxu1 %v3895_v21  ;;  %v1697_v61 = vpop.permute.xlu1 %1696 }
 0xebf   :  { %3410 = vmatpush3.msra.mxu1 %v4442_v59  ;;  %v1702_v20 = vsel %vm230_vm3, %v1697_v61, %v1700_v0 }
 0xec0   :  { %3411 = vmatprep.subr.mxu1 %v3895_v21 }
 0xec1   :  { %3412 = vmatpush3.msra.mxu1 %v4446_v60 }
 0xec2   :  { %3413 = vmatprep.subr.mxu1 %v3895_v21 }
 0xec3   :  { %3414 = vmatpush3.msra.mxu1 %v4450_v63 }
 0xec4   :  { %3415 = vmatprep.subr.mxu1 %v3895_v21 }
 0xec5   :  { %3416 = vmatpush3.msra.mxu1 %v4455_v22 }
 0xec6   :  { %3418 = vmatmul.mubr.msk.f32.vlgmr.msra.gmra.mxu1 %vm458_vm4, %v1702_v20  ;;  %3439 = vmatprep.subr.mxu1 %v3895_v21 }
 0xec7   :  { %3440 = vmatpush3.msra.mxu1 %v4463_v23  ;;  %3447 = vmatprep.mubr.msk.f32.mxu1 %vm3896_vm2, %v3895_v21 }
 0xec8   :  { %3441 = vmatprep.subr.mxu1 %v3895_v21 }
 0xec9   :  { %3442 = vmatpush3.msra.mxu1 %v4472_v42 }
 0xeca   :  { %3443 = vmatprep.subr.mxu1 %v3895_v21 }
 0xecb   :  { %3444 = vmatpush3.msra.mxu1 %v4479_v24 }
 0xecc   :  { %3445 = vmatprep.subr.mxu1 %v3895_v21 }
 0xecd   :  { %3446 = vmatpush3.msra.mxu1 %v4486_v5 }
 0xece   :  { %3448 = vmatmul.mubr.msk.f32.vlgmr.msra.gmra.mxu1 %vm230_vm3, %v1697_v61  ;;  %3469 = vmatprep.subr.mxu1 %v3895_v21 }
 0xecf   :  { %3470 = vmatpush3.msra.mxu1 %v4124_v44  ;;  %3485 = vmatprep.mubr.msk.f32.mxu1 %vm3896_vm2, %v3895_v21 }
 0xed0   :  { %3471 = vmatprep.subr.mxu1 %v3895_v21 }
 0xed1   :  { %3472 = vmatpush3.msra.mxu1 %v4126_v45 }
 0xed2   :  { %3473 = vmatprep.subr.mxu1 %v3895_v21 }
 0xed3   :  { %3474 = vmatpush3.msra.mxu1 %v4131_v46 }
 0xed4   :  { %3475 = vmatprep.subr.mxu1 %v3895_v21 }
 0xed5   :  { %3476 = vmatpush3.msra.mxu1 %v4137_v47 }
 0xed6   :  { %3477 = vmatprep.subr.mxu1 %v3895_v21 }
 0xed7   :  { %3478 = vmatpush3.msra.mxu1 %v4143_v49 }
 0xed8   :  { %3479 = vmatprep.subr.mxu1 %v3895_v21 }
 0xed9   :  { %3480 = vmatpush3.msra.mxu1 %v4149_v50 }
 0xeda   :  { %3481 = vmatprep.subr.mxu1 %v3895_v21 }
 0xedb   :  { %3482 = vmatpush3.msra.mxu1 %v4155_v51 }
 0xedc   :  { %3483 = vmatprep.subr.mxu1 %v3895_v21 }
 0xedd   :  { %3484 = vmatpush3.msra.mxu1 %v4161_v52 }
 0xede   :  { %3499 = vmatprep.subr.mxu1 %v3895_v21 }
 0xf76   :  { %v1567_v44 = vpop.f32.mrf.mxu1 }
 0xf77   :  { %v1568_v45 = vadd.f32 %v4230_v11, %v1567_v44 }
 0xf78   :  { %v3389_v46 = vpop.f32.mrf.mxu1 }
 0xf79   :  { %3683 = vtanh.f32 %v1568_v45  ;;  %v1571_v34 = vmul.f32 0.5, %v1568_v45 }
 0xf86   :  { %v3684_v47 = vpop.eup %3683  ;;  %v1772_v49 = vpop.f32.mrf.mxu1 }
 0xf87   :  { %v1773_v50 = vadd.f32 %v4510_v25, %v1772_v49  ;;  %1578 = vrot.lane.b32.xlu1 %v3684_v47, %s3897_s3 }
 0xf88   :  { %v3419_v51 = vpop.f32.mrf.mxu1 }
 0xf89   :  { %3685 = vtanh.f32 %v1773_v50  ;;  %v1776_v36 = vmul.f32 0.5, %v1773_v50 }
 0xf8e   :  { %v1970_v39 = vpop.f32.mrf.mxu1 }
 0xf8f   :  { %v1975_v26 = vrot.slane %v1970_v39, 6 }
 0xf90   :  { %v3449_v52 = vpop.f32.mrf.mxu1 }
 0xf91   :  { %v1977_v28 = vadd.f32 %v4037_v41, %v1975_v26 }
 0xf93   :  { %v1978_v11 = vadd.f32 %v4515_v30, %v1977_v28 }
 0xf95   :  { %3687 = vtanh.f32 %v1978_v11  ;;  %v1979_v62 = vmul.f32 0.5, %v1978_v11 }
 0xf96   :  { %v3686_v32 = vpop.eup %3685  ;;  %3689 = vtanh.f32 %v1571_v34  ;;  %v4582_v34 = vld [vmem:[#allocation7 + $0x70] sm:$0xff] }
 0xf97   :  { %1783 = vrot.lane.b32.xlu0 %v3686_v32, %s3897_s3  ;;  %3691 = vtanh.f32 %v1776_v36  ;;  %v4586_v36 = vld [vmem:[#allocation7 + $0x68] sm:$0xff] }
 0xf98   :  { %3693 = vtanh.f32 %v1979_v62 }
 0xfa2   :  { %v3688_v43 = vpop.eup %3687 }
 0xfa3   :  { %1989 = vrot.lane.b32.xlu1 %v3688_v43, %s3897_s3  ;;  %v3690_v37 = vpop.eup %3689  ;;  %v4576_v43 = vld [vmem:[#allocation7 + $0x78] sm:$0xff] }
 0xfa4   :  { %v1573_v38 = vadd.f32 1.0, %v3690_v37  ;;  %v3692_v1 = vpop.eup %3691  ;;  %v4590_v37 = vld [vmem:[#allocation7 + $0x60] sm:$0xff] }
 0xfa5   :  { %v1778_v2 = vadd.f32 1.0, %v3692_v1  ;;  %v3694_v7 = vpop.eup %3693  ;;  %v4610_v1 = vld [vmem:[#allocation8 + $0x2] ss:$0 sm:$0xff] }
 0xfa6   :  { %v1574_v48 = vmul.f32 0.5, %v1573_v38  ;;  %v1981_v10 = vadd.f32 1.0, %v3694_v7  ;;  %v4594_v38 = vld [vmem:[#allocation7 + $0x58] sm:$0xff] }
 0xfa7   :  { %v1779_v3 = vmul.f32 0.5, %v1778_v2 }
 0xfa8   :  { %v1982_v18 = vmul.f32 0.5, %v1981_v10  ;;  %v1576_v55 = vmul.f32 %v1574_v48, %v4404_v14 }
 0xfa9   :  { %v1781_v17 = vmul.f32 %v1779_v3, %v4408_v8 }
 0xfaa   :  { %v1987_v57 = vmul.f32 %v1985_v35, %v1982_v18 }
 0xff9   :  { %v1579_v53 = vpop.permute.xlu1 %1578 }
 0xffa   :  { %v1581_v54 = vmul.f32 %v1579_v53, %v1574_v48  ;;  %v4602_v53 = vld [vmem:[#allocation7 + $0x48] sm:$0xff] }
 0xffc   :  { %1583 = vrot.lane.b32.xlu0 %v1581_v54, %s3898_s16  ;;  %v4606_v54 = vld [vmem:[#allocation7 + $0x40] sm:$0xff] }
0x1009   :  { %v1784_v4 = vpop.permute.xlu0 %1783 }
0x100a   :  { %v1786_v6 = vmul.f32 %v1784_v4, %v1779_v3 }
0x100c   :  { %1788 = vrot.lane.b32.xlu1 %v1786_v6, %s3898_s16 }
0x1015   :  { %v1990_v12 = vpop.permute.xlu1 %1989 }
0x1016   :  { %v1992_v13 = vmul.f32 %v1990_v12, %v1982_v18 }
0x1018   :  { %1994 = vrot.lane.b32.xlu0 %v1992_v13, %s3898_s16 }
0x106e   :  { %v1584_v15 = vpop.permute.xlu0 %1583 }
0x106f   :  { %v4524_v16 = vadd.f32 %v1584_v15, %v1576_v55 }
0x1071   :  { %3695 = vtanh.f32 %v4524_v16 }
0x107e   :  { %v3696_v56 = vpop.eup %3695  ;;  %v1789_v9 = vpop.permute.xlu1 %1788 }
0x107f   :  { %v4528_v19 = vadd.f32 %v1789_v9, %v1781_v17  ;;  %1589 = vrot.lane.b32.xlu1 %v3696_v56, %s3897_s3 }
0x1081   :  { %3697 = vtanh.f32 %v4528_v19 }
0x108a   :  { %v1995_v58 = vpop.permute.xlu0 %1994 }
0x108b   :  { %v4533_v14 = vadd.f32 %v1995_v58, %v1987_v57 }
0x108d   :  { %3699 = vtanh.f32 %v4533_v14 }
0x108e   :  { %v3698_v61 = vpop.eup %3697 }
0x108f   :  { %1794 = vrot.lane.b32.xlu0 %v3698_v61, %s3897_s3 }
0x109a   :  { %v3700_v8 = vpop.eup %3699 }
0x109b   :  { %2000 = vrot.lane.b32.xlu1 %v3700_v8, %s3897_s3 }
0x10f1   :  { %v1590_v0 = vpop.permute.xlu1 %1589 }
0x10f2   :  { %v1592_v20 = vmul.f32 %v1590_v0, %v1574_v48  ;;  %v4598_v48 = vld [vmem:[#allocation7 + $0x50] sm:$0xff] }
0x10f4   :  { %1803 = vrot.lane.b32.xlu1 %v1592_v20, %s3897_s3 }
0x1101   :  { %v1795_v44 = vpop.permute.xlu0 %1794 }
0x1102   :  { %v1797_v45 = vmul.f32 %v1795_v44, %v1779_v3 }
0x1104   :  { %v2008_v46 = vrot.slane %v1797_v45, 6  ;;  %1799 = vrot.lane.b32.xlu0 %v1797_v45, %s3898_s16 }
0x1106   :  { %2009 = vrot.lane.b32.xlu1 %v2008_v46, %s3897_s3 }
0x110d   :  { %v2001_v40 = vpop.permute.xlu1 %2000 }
0x110e   :  { %v2003_v47 = vmul.f32 %v2001_v40, %v1982_v18 }
0x1110   :  { %2005 = vrot.lane.b32.xlu0 %v2003_v47, %s3898_s16  ;;  %v2213_v49 = vrot.slane %v2003_v47, 2 }
0x1114   :  { %2214 = vrot.lane.b32.xlu0 %v2213_v49, %s3898_s16 }
0x1166   :  { %v1804_v50 = vpop.permute.xlu1 %1803 }
0x1176   :  { %v1800_v51 = vpop.permute.xlu0 %1799 }
0x1177   :  { %v1806_v39 = vsel %vm230_vm3, %v1800_v51, %v1804_v50 }
0x1178   :  { %3437 = vmatmul.mubr.msk.f32.vlgmr.msra.gmra.mxu0 %vm458_vm4, %v1806_v39  ;;  %v2010_v26 = vpop.permute.xlu1 %2009 }
0x1179   :  { %3451 = vmatpush3.msra.mxu0 %v4424_v27  ;;  %3466 = vmatprep.mubr.msk.f32.mxu0 %vm3896_vm2, %v3895_v21 }
0x117a   :  { %3452 = vmatprep.subr.mxu0 %v3895_v21 }
0x117b   :  { %3453 = vmatpush3.msra.mxu0 %v4430_v29 }
0x117c   :  { %3454 = vmatprep.subr.mxu0 %v3895_v21 }
0x117d   :  { %3455 = vmatpush3.msra.mxu0 %v4434_v31 }
0x117e   :  { %3456 = vmatprep.subr.mxu0 %v3895_v21 }
0x117f   :  { %3457 = vmatpush3.msra.mxu0 %v4438_v33 }
0x1180   :  { %3458 = vmatprep.subr.mxu0 %v3895_v21 }
0x1181   :  { %3459 = vmatpush3.msra.mxu0 %v4442_v59 }
0x1182   :  { %3460 = vmatprep.subr.mxu0 %v3895_v21  ;;  %v2006_v52 = vpop.permute.xlu0 %2005 }
0x1183   :  { %v2012_v28 = vsel %vm230_vm3, %v2006_v52, %v2010_v26  ;;  %3461 = vmatpush3.msra.mxu0 %v4446_v60 }
0x1184   :  { %v2014_v11 = vrot.slane %v2012_v28, 2  ;;  %3462 = vmatprep.subr.mxu0 %v3895_v21 }
0x1185   :  { %3463 = vmatpush3.msra.mxu0 %v4450_v63 }
0x1186   :  { %3464 = vmatprep.subr.mxu0 %v3895_v21  ;;  %v2215_v32 = vpop.permute.xlu0 %2214 }
0x1187   :  { %3465 = vmatpush3.msra.mxu0 %v4455_v22 }
0x1188   :  { %3467 = vmatmul.mubr.msk.f32.vlgmr.msra.gmra.mxu0 %vm458_vm4, %v2014_v11  ;;  %3488 = vmatprep.subr.mxu0 %v3895_v21 }
0x1189   :  { %3489 = vmatpush3.msra.mxu0 %v4463_v23  ;;  %3496 = vmatprep.mubr.msk.f32.mxu0 %vm3896_vm2, %v3895_v21 }
0x118a   :  { %3490 = vmatprep.subr.mxu0 %v3895_v21 }
0x118b   :  { %3491 = vmatpush3.msra.mxu0 %v4472_v42 }
0x118c   :  { %3492 = vmatprep.subr.mxu0 %v3895_v21 }
0x118d   :  { %3493 = vmatpush3.msra.mxu0 %v4479_v24 }
0x118e   :  { %3494 = vmatprep.subr.mxu0 %v3895_v21 }
0x118f   :  { %3495 = vmatpush3.msra.mxu0 %v4486_v5 }
0x1190   :  { %3497 = vmatmul.mubr.msk.f32.vlgmr.msra.gmra.mxu0 %vm230_vm3, %v2215_v32  ;;  %3518 = vmatprep.subr.mxu0 %v3895_v21 }
0x1191   :  { %3519 = vmatpush3.msra.mxu0 %v4576_v43  ;;  %3534 = vmatprep.mubr.msk.f32.mxu0 %vm3896_vm2, %v3895_v21 }
0x1192   :  { %3520 = vmatprep.subr.mxu0 %v3895_v21 }
0x1193   :  { %3521 = vmatpush3.msra.mxu0 %v4582_v34 }
0x1194   :  { %3522 = vmatprep.subr.mxu0 %v3895_v21 }
0x1195   :  { %3523 = vmatpush3.msra.mxu0 %v4586_v36 }
0x1196   :  { %3524 = vmatprep.subr.mxu0 %v3895_v21 }
0x1197   :  { %3525 = vmatpush3.msra.mxu0 %v4590_v37 }
0x1198   :  { %3526 = vmatprep.subr.mxu0 %v3895_v21 }
0x1199   :  { %3527 = vmatpush3.msra.mxu0 %v4594_v38 }
0x119a   :  { %3528 = vmatprep.subr.mxu0 %v3895_v21 }
0x119b   :  { %3529 = vmatpush3.msra.mxu0 %v4598_v48 }
0x119c   :  { %3530 = vmatprep.subr.mxu0 %v3895_v21 }
0x119d   :  { %3531 = vmatpush3.msra.mxu0 %v4602_v53 }
0x119e   :  { %3532 = vmatprep.subr.mxu0 %v3895_v21 }
0x119f   :  { %3533 = vmatpush3.msra.mxu0 %v4606_v54 }
0x11a0   :  { %3548 = vmatprep.subr.mxu0 %v3895_v21 }
0x1238   :  { %v1876_v62 = vpop.f32.mrf.mxu0 }
0x1239   :  { %v1877_v2 = vadd.f32 %v4610_v1, %v1876_v62 }
0x123a   :  { %v3438_v3 = vpop.f32.mrf.mxu0 }
0x123b   :  { %3701 = vtanh.f32 %v1877_v2  ;;  %v1880_v9 = vmul.f32 0.5, %v1877_v2 }
0x1248   :  { %v3702_v4 = vpop.eup %3701  ;;  %v2083_v6 = vpop.f32.mrf.mxu0 }
0x1249   :  { %v2084_v7 = vadd.f32 %v4510_v25, %v2083_v6  ;;  %1887 = vrot.lane.b32.xlu1 %v3702_v4, %s3897_s3  ;;  %v2299_v4 = vrot.slane %v4533_v14, 6 }
0x124a   :  { %v3468_v10 = vpop.f32.mrf.mxu0 }
0x124b   :  { %3703 = vtanh.f32 %v2084_v7  ;;  %v2087_v35 = vmul.f32 0.5, %v2084_v7 }
0x1250   :  { %v2284_v18 = vpop.f32.mrf.mxu0 }
0x1251   :  { %v2289_v12 = vrot.slane %v2284_v18, 4 }
0x1252   :  { %v3498_v13 = vpop.f32.mrf.mxu0 }
0x1253   :  { %v2291_v55 = vadd.f32 %v4037_v41, %v2289_v12 }
0x1255   :  { %v2292_v15 = vadd.f32 %v4515_v30, %v2291_v55 }
0x1257   :  { %3705 = vtanh.f32 %v2292_v15  ;;  %v2293_v20 = vmul.f32 0.5, %v2292_v15 }
0x1258   :  { %v3704_v17 = vpop.eup %3703  ;;  %3707 = vtanh.f32 %v1880_v9 }
0x1259   :  { %2094 = vrot.lane.b32.xlu0 %v3704_v17, %s3897_s3  ;;  %3709 = vtanh.f32 %v2087_v35 }
0x125a   :  { %3711 = vtanh.f32 %v2293_v20 }
0x1264   :  { %v3706_v56 = vpop.eup %3705 }
0x1265   :  { %2303 = vrot.lane.b32.xlu1 %v3706_v56, %s3897_s3  ;;  %v3708_v57 = vpop.eup %3707 }
0x1266   :  { %v1882_v58 = vadd.f32 1.0, %v3708_v57  ;;  %v3710_v44 = vpop.eup %3709 }
0x1267   :  { %v2089_v45 = vadd.f32 1.0, %v3710_v44  ;;  %v3712_v49 = vpop.eup %3711 }
0x1268   :  { %v1883_v61 = vmul.f32 0.5, %v1882_v58  ;;  %v2295_v50 = vadd.f32 1.0, %v3712_v49 }
0x1269   :  { %v2090_v46 = vmul.f32 0.5, %v2089_v45 }
0x126a   :  { %v2296_v51 = vmul.f32 0.5, %v2295_v50  ;;  %v1885_v52 = vmul.f32 %v1883_v61, %v4524_v16 }
0x126b   :  { %v2092_v32 = vmul.f32 %v2090_v46, %v4528_v19 }
0x126c   :  { %v2301_v6 = vmul.f32 %v2299_v4, %v2296_v51 }
0x12bb   :  { %v1888_v8 = vpop.permute.xlu1 %1887 }
0x12bc   :  { %v1890_v0 = vmul.f32 %v1888_v8, %v1883_v61 }
0x12be   :  { %1892 = vrot.lane.b32.xlu0 %v1890_v0, %s3898_s16 }
0x12cb   :  { %v2095_v40 = vpop.permute.xlu0 %2094 }
0x12cc   :  { %v2097_v47 = vmul.f32 %v2095_v40, %v2090_v46 }
0x12ce   :  { %2099 = vrot.lane.b32.xlu1 %v2097_v47, %s3898_s16 }
0x12d7   :  { %v2304_v39 = vpop.permute.xlu1 %2303 }
0x12d8   :  { %v2306_v26 = vmul.f32 %v2304_v39, %v2296_v51 }
0x12da   :  { %2308 = vrot.lane.b32.xlu0 %v2306_v26, %s3898_s16 }
0x1330   :  { %v1893_v28 = vpop.permute.xlu0 %1892 }
0x1331   :  { %v4623_v11 = vadd.f32 %v1893_v28, %v1885_v52 }
0x1333   :  { %3713 = vtanh.f32 %v4623_v11 }
0x1340   :  { %v3714_v62 = vpop.eup %3713  ;;  %v2100_v2 = vpop.permute.xlu1 %2099 }
0x1341   :  { %v4627_v3 = vadd.f32 %v2100_v2, %v2092_v32  ;;  %1898 = vrot.lane.b32.xlu1 %v3714_v62, %s3897_s3 }
0x1343   :  { %3715 = vtanh.f32 %v4627_v3 }
0x134c   :  { %v2309_v7 = vpop.permute.xlu0 %2308 }
0x134d   :  { %v4632_v16 = vadd.f32 %v2309_v7, %v2301_v6 }
0x134f   :  { %3717 = vtanh.f32 %v4632_v16 }
0x1350   :  { %v3716_v10 = vpop.eup %3715 }
0x1351   :  { %2105 = vrot.lane.b32.xlu0 %v3716_v10, %s3897_s3 }
0x135c   :  { %v3718_v19 = vpop.eup %3717 }
0x135d   :  { %2314 = vrot.lane.b32.xlu1 %v3718_v19, %s3897_s3 }
0x13b3   :  { %v1899_v18 = vpop.permute.xlu1 %1898 }
0x13b4   :  { %v1901_v12 = vmul.f32 %v1899_v18, %v1883_v61 }
0x13b6   :  { %2114 = vrot.lane.b32.xlu1 %v1901_v12, %s3897_s3 }
0x13c3   :  { %v2106_v13 = vpop.permute.xlu0 %2105 }
0x13c4   :  { %v2108_v55 = vmul.f32 %v2106_v13, %v2090_v46 }
0x13c6   :  { %v2322_v15 = vrot.slane %v2108_v55, 4  ;;  %2110 = vrot.lane.b32.xlu0 %v2108_v55, %s3898_s16 }
0x13c8   :  { %2323 = vrot.lane.b32.xlu1 %v2322_v15, %s3897_s3 }
0x13cf   :  { %v2315_v14 = vpop.permute.xlu1 %2314 }
0x13d0   :  { %v2317_v17 = vmul.f32 %v2315_v14, %v2296_v51  ;;  %v2613_v14 = vrot.slane %v4632_v16, 6 }
0x13d2   :  { %2319 = vrot.lane.b32.xlu0 %v2317_v17, %s3898_s16  ;;  %v2527_v56 = vrot.slane %v2317_v17, 4 }
0x13d6   :  { %2528 = vrot.lane.b32.xlu0 %v2527_v56, %s3898_s16 }
0x1428   :  { %v2115_v9 = vpop.permute.xlu1 %2114 }
0x1438   :  { %v2111_v35 = vpop.permute.xlu0 %2110 }
0x1439   :  { %v2117_v57 = vsel %vm230_vm3, %v2111_v35, %v2115_v9 }
0x143a   :  { %3486 = vmatmul.mubr.msk.f32.vlgmr.msra.gmra.mxu1 %vm458_vm4, %v2117_v57  ;;  %v2324_v58 = vpop.permute.xlu1 %2323 }
0x143b   :  { %3500 = vmatpush3.msra.mxu1 %v4424_v27  ;;  %3515 = vmatprep.mubr.msk.f32.mxu1 %vm3896_vm2, %v3895_v21 }
0x143c   :  { %3501 = vmatprep.subr.mxu1 %v3895_v21 }
0x143d   :  { %3502 = vmatpush3.msra.mxu1 %v4430_v29 }
0x143e   :  { %3503 = vmatprep.subr.mxu1 %v3895_v21 }
0x143f   :  { %3504 = vmatpush3.msra.mxu1 %v4434_v31 }
0x1440   :  { %3505 = vmatprep.subr.mxu1 %v3895_v21 }
0x1441   :  { %3506 = vmatpush3.msra.mxu1 %v4438_v33 }
0x1442   :  { %3507 = vmatprep.subr.mxu1 %v3895_v21 }
0x1443   :  { %3508 = vmatpush3.msra.mxu1 %v4442_v59 }
0x1444   :  { %3509 = vmatprep.subr.mxu1 %v3895_v21  ;;  %v2320_v61 = vpop.permute.xlu0 %2319 }
0x1445   :  { %v2326_v8 = vsel %vm230_vm3, %v2320_v61, %v2324_v58  ;;  %3510 = vmatpush3.msra.mxu1 %v4446_v60 }
0x1446   :  { %v2328_v0 = vrot.slane %v2326_v8, 4  ;;  %3511 = vmatprep.subr.mxu1 %v3895_v21 }
0x1447   :  { %3512 = vmatpush3.msra.mxu1 %v4450_v63 }
0x1448   :  { %3513 = vmatprep.subr.mxu1 %v3895_v21  ;;  %v2529_v20 = vpop.permute.xlu0 %2528 }
0x1449   :  { %3514 = vmatpush3.msra.mxu1 %v4455_v22 }
0x144a   :  { %3516 = vmatmul.mubr.msk.f32.vlgmr.msra.gmra.mxu1 %vm458_vm4, %v2328_v0  ;;  %3537 = vmatprep.subr.mxu1 %v3895_v21 }
0x144b   :  { %3538 = vmatpush3.msra.mxu1 %v4463_v23  ;;  %3545 = vmatprep.mubr.msk.f32.mxu1 %vm3896_vm2, %v3895_v21 }
0x144c   :  { %3539 = vmatprep.subr.mxu1 %v3895_v21 }
0x144d   :  { %3540 = vmatpush3.msra.mxu1 %v4472_v42 }
0x144e   :  { %3541 = vmatprep.subr.mxu1 %v3895_v21 }
0x144f   :  { %3542 = vmatpush3.msra.mxu1 %v4479_v24 }
0x1450   :  { %3543 = vmatprep.subr.mxu1 %v3895_v21 }
0x1451   :  { %3544 = vmatpush3.msra.mxu1 %v4486_v5 }
0x1452   :  { %3546 = vmatmul.mubr.msk.f32.vlgmr.msra.gmra.mxu1 %vm230_vm3, %v2529_v20  ;;  %3567 = vmatprep.subr.mxu1 %v3895_v21 }
0x1453   :  { %3568 = vmatpush3.msra.mxu1 %v4576_v43  ;;  %3583 = vmatprep.mubr.msk.f32.mxu1 %vm3896_vm2, %v3895_v21 }
0x1454   :  { %3569 = vmatprep.subr.mxu1 %v3895_v21 }
0x1455   :  { %3570 = vmatpush3.msra.mxu1 %v4582_v34 }
0x1456   :  { %3571 = vmatprep.subr.mxu1 %v3895_v21 }
0x1457   :  { %3572 = vmatpush3.msra.mxu1 %v4586_v36 }
0x1458   :  { %3573 = vmatprep.subr.mxu1 %v3895_v21 }
0x1459   :  { %3574 = vmatpush3.msra.mxu1 %v4590_v37 }
0x145a   :  { %3575 = vmatprep.subr.mxu1 %v3895_v21 }
0x145b   :  { %3576 = vmatpush3.msra.mxu1 %v4594_v38 }
0x145c   :  { %3577 = vmatprep.subr.mxu1 %v3895_v21 }
0x145d   :  { %3578 = vmatpush3.msra.mxu1 %v4598_v48 }
0x145e   :  { %3579 = vmatprep.subr.mxu1 %v3895_v21 }
0x145f   :  { %3580 = vmatpush3.msra.mxu1 %v4602_v53 }
0x1460   :  { %3581 = vmatprep.subr.mxu1 %v3895_v21 }
0x1461   :  { %3582 = vmatpush3.msra.mxu1 %v4606_v54 }
0x14fa   :  { %v2187_v23 = vpop.f32.mrf.mxu1 }
0x14fb   :  { %v2188_v42 = vadd.f32 %v4610_v1, %v2187_v23 }
0x14fc   :  { %v3487_v24 = vpop.f32.mrf.mxu1 }
0x14fd   :  { %3719 = vtanh.f32 %v2188_v42  ;;  %v2191_v46 = vmul.f32 0.5, %v2188_v42 }
0x150a   :  { %v3720_v5 = vpop.eup %3719  ;;  %v2397_v43 = vpop.f32.mrf.mxu1 }
0x150b   :  { %v2398_v34 = vadd.f32 %v4510_v25, %v2397_v43  ;;  %2198 = vrot.lane.b32.xlu1 %v3720_v5, %s3897_s3 }
0x150c   :  { %v3517_v36 = vpop.f32.mrf.mxu1 }
0x150d   :  { %3721 = vtanh.f32 %v2398_v34  ;;  %v2401_v40 = vmul.f32 0.5, %v2398_v34 }
0x1512   :  { %v2598_v37 = vpop.f32.mrf.mxu1 }
0x1513   :  { %v2603_v38 = vrot.slane %v2598_v37, 2 }
0x1514   :  { %v3547_v48 = vpop.f32.mrf.mxu1 }
0x1515   :  { %v2605_v53 = vadd.f32 %v4037_v41, %v2603_v38 }
0x1517   :  { %v2606_v54 = vadd.f32 %v4515_v30, %v2605_v53 }
0x1519   :  { %3723 = vtanh.f32 %v2606_v54  ;;  %v2607_v26 = vmul.f32 0.5, %v2606_v54 }
0x151a   :  { %v3722_v44 = vpop.eup %3721  ;;  %3725 = vtanh.f32 %v2191_v46 }
0x151b   :  { %2408 = vrot.lane.b32.xlu0 %v3722_v44, %s3897_s3  ;;  %3727 = vtanh.f32 %v2401_v40 }
0x151c   :  { %3729 = vtanh.f32 %v2607_v26 }
0x1526   :  { %v3724_v45 = vpop.eup %3723 }
0x1527   :  { %2617 = vrot.lane.b32.xlu1 %v3724_v45, %s3897_s3  ;;  %v3726_v47 = vpop.eup %3725 }
0x1528   :  { %v2193_v49 = vadd.f32 1.0, %v3726_v47  ;;  %v3728_v41 = vpop.eup %3727 }
0x1529   :  { %v2403_v30 = vadd.f32 1.0, %v3728_v41  ;;  %v3730_v62 = vpop.eup %3729 }
0x152a   :  { %v2194_v50 = vmul.f32 0.5, %v2193_v49  ;;  %v2609_v2 = vadd.f32 1.0, %v3730_v62 }
0x152b   :  { %v2404_v52 = vmul.f32 0.5, %v2403_v30 }
0x152c   :  { %v2610_v4 = vmul.f32 0.5, %v2609_v2  ;;  %v2196_v10 = vmul.f32 %v2194_v50, %v4623_v11 }
0x152d   :  { %v2406_v12 = vmul.f32 %v2404_v52, %v4627_v3 }
0x152e   :  { %v2615_v17 = vmul.f32 %v2613_v14, %v2610_v4 }
0x157d   :  { %v2199_v51 = vpop.permute.xlu1 %2198 }
0x157e   :  { %v2201_v39 = vmul.f32 %v2199_v51, %v2194_v50 }
0x1580   :  { %2203 = vrot.lane.b32.xlu0 %v2201_v39, %s3898_s16 }
0x158d   :  { %v2409_v28 = vpop.permute.xlu0 %2408 }
0x158e   :  { %v2411_v32 = vmul.f32 %v2409_v28, %v2404_v52 }
0x1590   :  { %2413 = vrot.lane.b32.xlu1 %v2411_v32, %s3898_s16 }
0x1599   :  { %v2618_v6 = vpop.permute.xlu1 %2617 }
0x159a   :  { %v2620_v7 = vmul.f32 %v2618_v6, %v2610_v4 }
0x159c   :  { %2622 = vrot.lane.b32.xlu0 %v2620_v7, %s3898_s16 }
0x15f2   :  { %v2204_v19 = vpop.permute.xlu0 %2203 }
0x15f3   :  { %v4703_v18 = vadd.f32 %v2204_v19, %v2196_v10 }
0x15f5   :  { %3731 = vtanh.f32 %v4703_v18 }
0x1602   :  { %v3732_v13 = vpop.eup %3731  ;;  %v2414_v55 = vpop.permute.xlu1 %2413 }
0x1603   :  { %v4707_v15 = vadd.f32 %v2414_v55, %v2406_v12  ;;  %2209 = vrot.lane.b32.xlu1 %v3732_v13, %s3897_s3 }
0x1605   :  { %3733 = vtanh.f32 %v4707_v15 }
0x160e   :  { %v2623_v56 = vpop.permute.xlu0 %2622 }
0x160f   :  { %v2625_v11 = vadd.f32 %v2623_v56, %v2615_v17 }
0x1611   :  { %3735 = vtanh.f32 %v2625_v11 }
0x1612   :  { %v3734_v9 = vpop.eup %3733 }
0x1613   :  { %2419 = vrot.lane.b32.xlu0 %v3734_v9, %s3897_s3 }
0x161e   :  { %v3736_v35 = vpop.eup %3735 }
0x161f   :  { %2628 = vrot.lane.b32.xlu1 %v3736_v35, %s3897_s3 }
0x1675   :  { %v2210_v3 = vpop.permute.xlu1 %2209 }
0x1676   :  { %v2212_v57 = vmul.f32 %v2210_v3, %v2194_v50  ;;  %v2843_v3 = vld [vmem:[%s4790_s7 + $0x10] sm:$0xff] }
0x1678   :  { %2428 = vrot.lane.b32.xlu1 %v2212_v57, %s3897_s3  ;;  %v2842_v57 = vld [vmem:[%s4790_s7 + $0x8] sm:$0xff] }
0x1685   :  { %v2420_v58 = vpop.permute.xlu0 %2419 }
0x1686   :  { %v2422_v61 = vmul.f32 %v2420_v58, %v2404_v52  ;;  %v2841_v58 = vld [vmem:[%s4790_s7] sm:$0xff] }
0x1688   :  { %v2636_v8 = vrot.slane %v2422_v61, 2  ;;  %2424 = vrot.lane.b32.xlu0 %v2422_v61, %s3898_s16 }
0x168a   :  { %2637 = vrot.lane.b32.xlu1 %v2636_v8, %s3897_s3 }
0x1691   :  { %v2629_v16 = vpop.permute.xlu1 %2628 }
0x1692   :  { %v2631_v0 = vmul.f32 %v2629_v16, %v2610_v4 }
0x1694   :  { %2633 = vrot.lane.b32.xlu0 %v2631_v0, %s3898_s16 }
0x16ea   :  { %v2429_v20 = vpop.permute.xlu1 %2428 }
0x16fa   :  { %v2425_v23 = vpop.permute.xlu0 %2424 }
0x16fb   :  { %v2431_v42 = vsel %vm230_vm3, %v2425_v23, %v2429_v20  ;;  %v2978_v20 = vld [vmem:[%s4791_s8] ss:$0 sm:$0xff] }
0x16fc   :  { %3535 = vmatmul.mubr.msk.f32.vlgmr.msra.gmra.mxu0 %vm458_vm4, %v2431_v42 }
0x16fd   :  { %3549 = vmatpush3.msra.mxu0 %v4424_v27  ;;  %3564 = vmatprep.mubr.msk.f32.mxu0 %vm3896_vm2, %v3895_v21  ;;  %v2638_v27 = vpop.permute.xlu1 %2637 }
0x16fe   :  { %3550 = vmatprep.subr.mxu0 %v3895_v21 }
0x16ff   :  { %3551 = vmatpush3.msra.mxu0 %v4430_v29 }
0x1700   :  { %3552 = vmatprep.subr.mxu0 %v3895_v21 }
0x1701   :  { %3553 = vmatpush3.msra.mxu0 %v4434_v31 }
0x1702   :  { %3554 = vmatprep.subr.mxu0 %v3895_v21 }
0x1703   :  { %3555 = vmatpush3.msra.mxu0 %v4438_v33 }
0x1704   :  { %3556 = vmatprep.subr.mxu0 %v3895_v21 }
0x1705   :  { %3557 = vmatpush3.msra.mxu0 %v4442_v59 }
0x1706   :  { %3558 = vmatprep.subr.mxu0 %v3895_v21  ;;  %v2634_v24 = vpop.permute.xlu0 %2633 }
0x1707   :  { %v2640_v5 = vsel %vm230_vm3, %v2634_v24, %v2638_v27  ;;  %3559 = vmatpush3.msra.mxu0 %v4446_v60 }
0x1708   :  { %v2642_v29 = vrot.slane %v2640_v5, 6  ;;  %3560 = vmatprep.subr.mxu0 %v3895_v21 }
0x1709   :  { %3561 = vmatpush3.msra.mxu0 %v4450_v63 }
0x170a   :  { %3562 = vmatprep.subr.mxu0 %v3895_v21 }
0x170b   :  { %3563 = vmatpush3.msra.mxu0 %v4455_v22 }
0x170c   :  { %3565 = vmatmul.mubr.msk.f32.vlgmr.msra.gmra.mxu0 %vm458_vm4, %v2642_v29  ;;  %3586 = vmatprep.subr.mxu0 %v3895_v21 }
0x170d   :  { %3594 = vmatprep.mubr.msk.f32.mxu0 %vm3896_vm2, %v3895_v21 }
0x17bc   :  { %v2501_v31 = vpop.f32.mrf.mxu0 }
0x17bd   :  { %v2502_v33 = vadd.f32 %v4610_v1, %v2501_v31 }
0x17be   :  { %v3536_v59 = vpop.f32.mrf.mxu0 }
0x17bf   :  { %3737 = vtanh.f32 %v2502_v33  ;;  %v2505_v36 = vmul.f32 0.5, %v2502_v33 }
0x17cc   :  { %v3738_v60 = vpop.eup %3737  ;;  %v2711_v43 = vpop.f32.mrf.mxu0 }
0x17cd   :  { %v2712_v63 = vadd.f32 %v4510_v25, %v2711_v43  ;;  %2512 = vrot.lane.b32.xlu0 %v3738_v60, %s3897_s3 }
0x17ce   :  { %v3566_v34 = vpop.f32.mrf.mxu0 }
0x17cf   :  { %3739 = vtanh.f32 %v2712_v63  ;;  %v2715_v37 = vmul.f32 0.5, %v2712_v63 }
0x17d0   :  { %3741 = vtanh.f32 %v2505_v36 }
0x17d1   :  { %3743 = vtanh.f32 %v2715_v37 }
0x17dc   :  { %v3740_v22 = vpop.eup %3739 }
0x17dd   :  { %2722 = vrot.lane.b32.xlu1 %v3740_v22, %s3897_s3  ;;  %v3742_v38 = vpop.eup %3741 }
0x17de   :  { %v2507_v48 = vadd.f32 1.0, %v3742_v38  ;;  %v3744_v45 = vpop.eup %3743 }
0x17df   :  { %v2717_v25 = vadd.f32 1.0, %v3744_v45 }
0x17e0   :  { %v2508_v53 = vmul.f32 0.5, %v2507_v48 }
0x17e1   :  { %v2718_v46 = vmul.f32 0.5, %v2717_v25 }
0x17e2   :  { %v2510_v49 = vmul.f32 %v2508_v53, %v4703_v18 }
0x17e3   :  { %v2720_v39 = vmul.f32 %v2718_v46, %v4707_v15 }
0x183f   :  { %v2513_v54 = vpop.permute.xlu0 %2512 }
0x1840   :  { %v2515_v44 = vmul.f32 %v2513_v54, %v2508_v53 }
0x1842   :  { %2517 = vrot.lane.b32.xlu0 %v2515_v44, %s3898_s16 }
0x184f   :  { %v2723_v40 = vpop.permute.xlu1 %2722 }
0x1850   :  { %v2725_v47 = vmul.f32 %v2723_v40, %v2718_v46 }
0x1852   :  { %2727 = vrot.lane.b32.xlu1 %v2725_v47, %s3898_s16 }
0x18b4   :  { %v2518_v50 = vpop.permute.xlu0 %2517 }
0x18b5   :  { %v2520_v51 = vadd.f32 %v2518_v50, %v2510_v49 }
0x18b7   :  { %3745 = vtanh.f32 %v2520_v51 }
0x18c4   :  { %v3746_v26 = vpop.eup %3745  ;;  %v2728_v41 = vpop.permute.xlu1 %2727 }
0x18c5   :  { %v2730_v30 = vadd.f32 %v2728_v41, %v2720_v39  ;;  %2523 = vrot.lane.b32.xlu0 %v3746_v26, %s3897_s3 }
0x18c7   :  { %3747 = vtanh.f32 %v2730_v30 }
0x18d4   :  { %v3748_v52 = vpop.eup %3747 }
0x18d5   :  { %2733 = vrot.lane.b32.xlu1 %v3748_v52, %s3897_s3 }
0x1937   :  { %v2524_v28 = vpop.permute.xlu0 %2523 }
0x1938   :  { %v2526_v32 = vmul.f32 %v2524_v28, %v2508_v53 }
0x193a   :  { %2742 = vrot.lane.b32.xlu1 %v2526_v32, %s3897_s3 }
0x1947   :  { %v2734_v62 = vpop.permute.xlu1 %2733 }
0x1948   :  { %v2736_v2 = vmul.f32 %v2734_v62, %v2718_v46 }
0x194a   :  { %2738 = vrot.lane.b32.xlu0 %v2736_v2, %s3898_s16 }
0x19ac   :  { %v2743_v4 = vpop.permute.xlu1 %2742 }
0x19bc   :  { %v2739_v6 = vpop.permute.xlu0 %2738 }
0x19bd   :  { %v2745_v7 = vsel %vm230_vm3, %v2739_v6, %v2743_v4 }
0x19be   :  { %3584 = vmatmul.mubr.msk.f32.vlgmr.msra.gmra.mxu1 %vm458_vm4, %v2745_v7 }
0x1a7e   :  { %v2815_v10 = vpop.f32.mrf.mxu1 }
0x1a7f   :  { %v2816_v19 = vadd.f32 %v4610_v1, %v2815_v10  ;;  %v2844_v1 = vld [vmem:[%s4790_s7 + $0x18] sm:$0xff]  ;;  %s2935_s7 = sshll.u32 %s3899_s10, 4  ;;  %s2936_s7 = int_to_ptr.vmem [resolvable:$true] %s2935_s7 }
0x1a80   :  { %v3585_v18 = vpop.f32.mrf.mxu1  ;;  %3587 = vmatpush3.msra.mxu0 %v2844_v1  ;;  %s3858_s11 = scalar_lea.vmem %s2936_s7, 32  ;;  %p3863_p7 = scmp.lt.s32.totalorder %s2936_s7, %s2936_s7 }
0x1a81   :  { %3749 = vtanh.f32 %v2816_v19  ;;  %v2819_v13 = vmul.f32 0.5, %v2816_v19  ;;  %3588 = vmatprep.subr.mxu0 %v3895_v21  ;;  %p3859_p6 = scmp.ne.s32.totalorder %s2936_s7, %s3858_s11  ;;  %p3864_p8 = scmp.lt.s32.totalorder %s3858_s11, %s3858_s11 }
0x1a82   :  { %3589 = vmatpush3.msra.mxu0 %v2843_v3 }
0x1a83   :  { %3751 = vtanh.f32 %v2819_v13  ;;  %3590 = vmatprep.subr.mxu0 %v3895_v21  ;;  %p3865_p9 = por %p3864_p8, %p3863_p7 }
0x1a84   :  { %3591 = vmatpush3.msra.mxu0 %v2842_v57 }
0x1a85   :  { %3592 = vmatprep.subr.mxu0 %v3895_v21  ;;  %p3866_p10 = pnand %p3865_p9, %p3859_p6 }
0x1a86   :  { %3593 = vmatpush3.msra.mxu0 %v2841_v58 }
0x1a8e   :  { %v3750_v12 = vpop.eup %3749 }
0x1a8f   :  { %2826 = vrot.lane.b32.xlu0 %v3750_v12, %s3897_s3 }
0x1a90   :  { %v3752_v55 = vpop.eup %3751 }
0x1a91   :  { %v2821_v15 = vadd.f32 1.0, %v3752_v55 }
0x1a93   :  { %v2822_v14 = vmul.f32 0.5, %v2821_v15 }
0x1a95   :  { %v2824_v11 = vmul.f32 %v2822_v14, %v2520_v51 }
0x1b01   :  { %v2827_v17 = vpop.permute.xlu0 %2826 }
0x1b02   :  { %v2829_v56 = vmul.f32 %v2827_v17, %v2822_v14 }
0x1b04   :  { %2831 = vrot.lane.b32.xlu1 %v2829_v56, %s3898_s16 }
0x1b76   :  { %v2832_v9 = vpop.permute.xlu1 %2831 }
0x1b77   :  { %v2834_v35 = vadd.f32 %v2832_v9, %v2824_v11 }
0x1b79   :  { %3753 = vtanh.f32 %v2834_v35 }
0x1b86   :  { %v3754_v61 = vpop.eup %3753 }
0x1b87   :  { %2837 = vrot.lane.b32.xlu0 %v3754_v61, %s3897_s3 }
0x1bf9   :  { %v2838_v8 = vpop.permute.xlu0 %2837 }
0x1bfa   :  { %v2840_v16 = vmul.f32 %v2838_v8, %v2822_v14 }
0x1bfc   :  { %2853 = vrot.lane.b32.xlu1 %v2840_v16, %s3898_s16 }
0x1c6e   :  { %v2854_v0 = vpop.permute.xlu1 %2853 }
0x1c6f   :  { %3595 = vmatmul.mubr.msk.f32.vlgmr.msra.gmra.mxu0 %vm230_vm3, %v2854_v0 }
0x1d2f   :  { %v2923_v23 = vpop.f32.mrf.mxu0 }
0x1d30   :  { %v2924_v21 = vadd.f32 %v2978_v20, %v2923_v23 }
0x1d31   :  { %v3596_v42 = vpop.f32.mrf.mxu0 }
0x1d32   :  { %2928 = vst.msk [vmem:[#allocation10] sm:$0x3] %vm2927_vm5, %v2924_v21 }
0x1d33   :  { %3869 = shalt.err (!%p3866_p10)
}
0x1d34   :  { %2938 = dma.vmem_to_hbm [thread:$0]  %s2936_s7, 32, %s4792_s9, [#allocation4]  }
0x1d35   :  { %3884 = dma.done.wait [#allocation4], 32  }
0x1d36   :  { %3885 = vsyncadd [#allocation4], 4294967264 }
0x1d37   :  { %2942 = vsyncpa [#allocation3], 1 }
0x1d38   :  { %2943 = vsyncpa [#allocation6], 1 }
0x1d39   :  { %2944 = vsyncpa [#allocation9], 1 }
0x1d3a   :  { %2945 = vsyncpa [#allocation4], 1 }

</bundles_post_ra>
